<compile_context>
chip_gen: v5e
topology: v5e:2x2
jax: 0.10.0
libtpu: 0.0.40
codegen_flags: <defaults>
</compile_context>

<pallas_src>
import jax
import jax.numpy as jnp
from jax import lax
from jax.experimental import pallas as pl
from jax.experimental.pallas import tpu as pltpu

EPS = 1e-5

# Set to jnp.bfloat16 on v6e/v7x for ~2x MXU throughput (reduced precision);
# float32 keeps exact module semantics.
MATMUL_DTYPE = jnp.float32


# ----------------------------------------------------------------------------
# Fused Pallas kernel
# ----------------------------------------------------------------------------
def _make_fused_kernel(wp, L1, L2, cin_p, cout):
    """wp   : padded row width (W+2)
       L1   : conv1 output extent (y1 already in conv2-input padded layout)
       L2   : conv2 output extent
       cin_p: input channels padded to a multiple of 8
       cout : output channels"""

    def kernel(x_ref, w1_ref, b1_ref, w2_ref, b2_ref, m_ref, s_ref,
               o_ref, tap1_ref, tap2_ref):
        # x_ref   : (cin_p, N*Lx)   zero-padded, row-flattened, batch on lanes
        # w*_ref  : (cout, 9*C)     conv weights with BN scale folded in
        # b*_ref  : (cout, 1)       folded BN bias
        # m_ref   : (1, L1)         1.0 on real pixels, 0.0 on halo/pad/garbage
        # s_ref   : (L2, N*Ho*Wo)   avg-pool selector (entries 1/4)
        # o_ref   : (cout, N*Ho*Wo)
        # tap1_ref: (9*cin_p, L1)   VMEM scratch: stacked conv1 taps
        # tap2_ref: (9*cout, L2)    VMEM scratch: stacked conv2 taps

        # ---- conv1 + folded BN1 + ReLU (single stacked-K matmul) ----------
        for kh in range(3):
            for kw in range(3):
                t = kh * 3 + kw
                off = kh * wp + kw
                tap1_ref[t * cin_p:(t + 1) * cin_p, :] = x_ref[:, off:off + L1]
        acc1 = jnp.dot(w1_ref[...], tap1_ref[...],
                       preferred_element_type=jnp.float32)        # (cout, L1)
        # mask zeroes halo/pad columns so y1 doubles as conv2's zero halo.
        y1 = jnp.maximum(acc1 + b1_ref[...], 0.0) * m_ref[...]
        y1 = y1.astype(tap2_ref.dtype)

        # ---- conv2 + folded BN2 + ReLU (single stacked-K matmul) ----------
        for kh in range(3):
            for kw in range(3):
                t = kh * 3 + kw
                off = kh * wp + kw
                tap2_ref[t * cout:(t + 1) * cout, :] = y1[:, off:off + L2]
        acc2 = jnp.dot(w2_ref[...], tap2_ref[...],
                       preferred_element_type=jnp.float32)        # (cout, L2)
        y2 = jnp.maximum(acc2 + b2_ref[...], 0.0)

        # ---- 2x2 average pool: selector matmul (1/4 + masking folded in) --
        o_ref[...] = jnp.dot(y2, s_ref[...],
                             preferred_element_type=jnp.float32
                             ).astype(o_ref.dtype)

    return kernel


# ----------------------------------------------------------------------------
# Host-side glue (BN folding, weight packing, wrapper)
# ----------------------------------------------------------------------------
def _fold_bn(gamma, beta, mean, var):
    scale = gamma / jnp.sqrt(var + EPS)
    bias = beta - mean * scale
    return scale, bias


def _pack_weight(w_oihw, scale, cin_pad):
    # (Cout, Cin, 3, 3) -> (Cout, 9*cin_pad), index [co, (kh*3+kw)*cin_pad+ci]
    cout, cin = w_oihw.shape[0], w_oihw.shape[1]
    w = jnp.pad(w_oihw, ((0, 0), (0, cin_pad - cin), (0, 0), (0, 0)))
    w = jnp.transpose(w, (0, 2, 3, 1)).reshape(cout, 9 * cin_pad)
    return w * scale[:, None]


def conv_block_forward(x_nchw, p, pool=(2, 2)):
    N, Cin, H, W = x_nchw.shape
    Cout = p["w1"].shape[0]
    ph, pw = pool
    Ho, Wo = H // ph, W // pw

    wp = W + 2                       # padded row width
    hw = H * wp                      # per-image conv2 output extent
    Lx = (H + 6) * wp                # per-image padded flat input length
    L1 = N * Lx - 3 * wp             # conv1 output extent (padded y1 layout)
    L2 = (N - 1) * Lx + hw           # conv2 output extent
    cin_p = ((Cin + 7) // 8) * 8     # pad Cin so tap-stack rows stay 8-aligned
    cdt = MATMUL_DTYPE

    # ---- tiny host-side prep -------------------------------------------------
    s1, b1 = _fold_bn(p["g1"], p["b1"], p["m1"], p["v1"])
    s2, b2 = _fold_bn(p["g2"], p["b2"], p["m2"], p["v2"])
    w1_eff = _pack_weight(p["w1"], s1, cin_p).astype(cdt)    # (Cout, 9*cin_p)
    w2_eff = _pack_weight(p["w2"], s2, Cout).astype(cdt)     # (Cout, 9*Cout)
    b1_eff = b1.reshape(Cout, 1).astype(jnp.float32)
    b2_eff = b2.reshape(Cout, 1).astype(jnp.float32)

    # x: original pixel (h, w) of image n lands at lane n*Lx + (h+2)*wp + (w+2)
    # (2 zero rows on top, 4 below, 2 zero cols on the left) so that conv1's
    # output is produced directly in conv2's padded-input layout.
    x_p = jnp.pad(x_nchw, ((0, 0), (0, cin_p - Cin), (2, 4), (2, 0)))
    x_flat = jnp.transpose(x_p.reshape(N, cin_p, Lx),
                           (1, 0, 2)).reshape(cin_p, N * Lx).astype(cdt)

    # conv1-extent mask: 1.0 only on real data positions (r in [1,H], c in [1,W])
    g1 = jnp.arange(L1)
    r1 = (g1 % Lx) // wp
    c1 = (g1 % Lx) % wp
    mask = ((r1 >= 1) & (r1 <= H) & (c1 >= 1) & (c1 <= W)
            ).astype(jnp.float32).reshape(1, L1)

    # avg-pool selector over conv2's extent (1/4 factor + pad masking folded in)
    g2 = jnp.arange(L2)
    n_i = g2 // Lx
    hh = (g2 % Lx) // wp
    ww = (g2 % Lx) % wp
    valid = (hh < H) & (ww < W)
    cols = jnp.where(valid, n_i * (Ho * Wo) + (hh // ph) * Wo + (ww // pw), 0)
    vals = jnp.where(valid, 1.0 / (ph * pw), 0.0)
    sel = jnp.zeros((L2, N * Ho * Wo), jnp.float32).at[g2, cols].add(vals)

    kernel = _make_fused_kernel(wp, L1, L2, cin_p, Cout)

    esize = 2 if cdt == jnp.bfloat16 else 4
    flops = (2 * Cout * 9 * cin_p * L1 + 2 * Cout * 9 * Cout * L2
             + 2 * Cout * L2 * (N * Ho * Wo))
    bytes_accessed = (esize * (cin_p * N * Lx + Cout * 9 * cin_p
                               + Cout * 9 * Cout)
                      + 4 * (2 * Cout + L1 + L2 * N * Ho * Wo
                             + Cout * N * Ho * Wo))
    ce = pl.CostEstimate(flops=flops, transcendentals=0,
                         bytes_accessed=bytes_accessed)

    out = pl.pallas_call(
        kernel,
        out_shape=jax.ShapeDtypeStruct((Cout, N * Ho * Wo), jnp.float32),
        grid_spec=pltpu.PrefetchScalarGridSpec(
            num_scalar_prefetch=0,
            grid=(1,),                        # whole batch fused in one step
            in_specs=[
                pl.BlockSpec((cin_p, N * Lx), lambda i: (0, 0)),
                pl.BlockSpec((Cout, 9 * cin_p), lambda i: (0, 0)),
                pl.BlockSpec((Cout, 1), lambda i: (0, 0)),
                pl.BlockSpec((Cout, 9 * Cout), lambda i: (0, 0)),
                pl.BlockSpec((Cout, 1), lambda i: (0, 0)),
                pl.BlockSpec((1, L1), lambda i: (0, 0)),
                pl.BlockSpec((L2, N * Ho * Wo), lambda i: (0, 0)),
            ],
            out_specs=pl.BlockSpec((Cout, N * Ho * Wo), lambda i: (0, 0)),
            scratch_shapes=[pltpu.VMEM((9 * cin_p, L1), cdt),
                            pltpu.VMEM((9 * Cout, L2), cdt)],
        ),
        compiler_params=pltpu.CompilerParams(
            dimension_semantics=("arbitrary",)),
        cost_estimate=ce,
    )(x_flat, w1_eff, b1_eff, w2_eff, b2_eff, mask, sel)

    # (Cout, N*Ho*Wo) -> (N, Cout, Ho, Wo)
    return out.reshape(Cout, N, Ho, Wo).transpose(1, 0, 2, 3)


# ----------------------------------------------------------------------------
# Pure-JAX reference (same semantics as the PyTorch module in eval mode)
# ----------------------------------------------------------------------------
def ref_forward(x_nchw, p):
    def bn(y, g, b, m, v):
        return ((y - m[None, :, None, None])
                * (g / jnp.sqrt(v + EPS))[None, :, None, None]
                + b[None, :, None, None])

    dn = ("NCHW", "OIHW", "NCHW")
    y = lax.conv_general_dilated(x_nchw, p["w1"], (1, 1), ((1, 1), (1, 1)),
                                 dimension_numbers=dn)
    y = jnp.maximum(bn(y, p["g1"], p["b1"], p["m1"], p["v1"]), 0.0)
    y = lax.conv_general_dilated(y, p["w2"], (1, 1), ((1, 1), (1, 1)),
                                 dimension_numbers=dn)
    y = jnp.maximum(bn(y, p["g2"], p["b2"], p["m2"], p["v2"]), 0.0)
    N, C, H, W = y.shape
    return y.reshape(N, C, H // 2, 2, W // 2, 2).mean(axis=(3, 5))


# ----------------------------------------------------------------------------
if __name__ == "__main__":
    N, Cin, Cout, H, W = 2, 4, 16, 16, 16
    key = jax.random.PRNGKey(0)
    ks = jax.random.split(key, 11)

    params = {
        "w1": 0.1 * jax.random.normal(ks[0], (Cout, Cin, 3, 3), jnp.float32),
        "g1": 1.0 + 0.1 * jax.random.normal(ks[1], (Cout,), jnp.float32),
        "b1": 0.1 * jax.random.normal(ks[2], (Cout,), jnp.float32),
        "m1": 0.1 * jax.random.normal(ks[3], (Cout,), jnp.float32),
        "v1": 0.5 + jnp.abs(jax.random.normal(ks[4], (Cout,), jnp.float32)),
        "w2": 0.1 * jax.random.normal(ks[5], (Cout, Cout, 3, 3), jnp.float32),
        "g2": 1.0 + 0.1 * jax.random.normal(ks[6], (Cout,), jnp.float32),
        "b2": 0.1 * jax.random.normal(ks[7], (Cout,), jnp.float32),
        "m2": 0.1 * jax.random.normal(ks[8], (Cout,), jnp.float32),
        "v2": 0.5 + jnp.abs(jax.random.normal(ks[9], (Cout,), jnp.float32)),
    }
    x = jax.random.normal(ks[10], (N, Cin, H, W), jnp.float32)

    out = jax.block_until_ready(conv_block_forward(x, params))
    ref = jax.block_until_ready(ref_forward(x, params))

    assert out.shape == (N, Cout, H // 2, W // 2), out.shape
    if not jnp.allclose(out, ref, atol=2e-4, rtol=2e-4):
        raise AssertionError(
            f"mismatch: max abs diff = {jnp.max(jnp.abs(out - ref))}")
    print("KERNEL_OK")
</pallas_src>

<mosaic_0001>
module attributes {stable_mosaic.version = 11 : i64} {
  func.func @kernel(%arg0: i32, %arg1: memref<8x792xf32, #tpu.memory_space<vmem>>, %arg2: memref<16x72xf32, #tpu.memory_space<vmem>>, %arg3: memref<16x1xf32, #tpu.memory_space<vmem>>, %arg4: memref<16x144xf32, #tpu.memory_space<vmem>>, %arg5: memref<16x1xf32, #tpu.memory_space<vmem>>, %arg6: memref<1x738xf32, #tpu.memory_space<vmem>>, %arg7: memref<684x128xf32, #tpu.memory_space<vmem>>, %arg8: memref<16x128xf32, #tpu.memory_space<vmem>>, %arg9: memref<72x738xf32, #tpu.memory_space<vmem>>, %arg10: memref<144x684xf32, #tpu.memory_space<vmem>>) attributes {dimension_semantics = [#tpu.dimension_semantics<arbitrary>], iteration_bounds = array<i64: 1>, scalar_prefetch = 0 : i64, scratch_operands = 2 : i64, tpu.core_type = #tpu.core_type<tc>, window_params = [{pipeline_mode = #tpu.pipeline_mode<synchronous>, transform_indices = @transform_0, window_bounds = array<i64: 8, 792>}, {pipeline_mode = #tpu.pipeline_mode<synchronous>, transform_indices = @transform_1, window_bounds = array<i64: 16, 72>}, {pipeline_mode = #tpu.pipeline_mode<synchronous>, transform_indices = @transform_2, window_bounds = array<i64: 16, 1>}, {pipeline_mode = #tpu.pipeline_mode<synchronous>, transform_indices = @transform_3, window_bounds = array<i64: 16, 144>}, {pipeline_mode = #tpu.pipeline_mode<synchronous>, transform_indices = @transform_4, window_bounds = array<i64: 16, 1>}, {pipeline_mode = #tpu.pipeline_mode<synchronous>, transform_indices = @transform_5, window_bounds = array<i64: 1, 738>}, {pipeline_mode = #tpu.pipeline_mode<synchronous>, transform_indices = @transform_6, window_bounds = array<i64: 684, 128>}, {pipeline_mode = #tpu.pipeline_mode<synchronous>, transform_indices = @transform_7, window_bounds = array<i64: 16, 128>}]} {
    %c0 = arith.constant 0 : index
    %c0_0 = arith.constant 0 : index
    %0 = vector.load %arg1[%c0, %c0_0] : memref<8x792xf32, #tpu.memory_space<vmem>>, vector<8x738xf32>
    %c0_1 = arith.constant 0 : index
    %c0_2 = arith.constant 0 : index
    %1 = vector.load %arg9[%c0_1, %c0_2] : memref<72x738xf32, #tpu.memory_space<vmem>>, vector<8x738xf32>
    tpu.vector_store %arg9[%c0_1, %c0_2], %0 {strides = array<i32>} : memref<72x738xf32, #tpu.memory_space<vmem>>, vector<8x738xf32>,
    %c0_3 = arith.constant 0 : index
    %c1 = arith.constant 1 : index
    %2 = vector.load %arg1[%c0_3, %c1] : memref<8x792xf32, #tpu.memory_space<vmem>>, vector<8x738xf32>
    %c8 = arith.constant 8 : index
    %c0_4 = arith.constant 0 : index
    %3 = vector.load %arg9[%c8, %c0_4] : memref<72x738xf32, #tpu.memory_space<vmem>>, vector<8x738xf32>
    tpu.vector_store %arg9[%c8, %c0_4], %2 {strides = array<i32>} : memref<72x738xf32, #tpu.memory_space<vmem>>, vector<8x738xf32>,
    %c0_5 = arith.constant 0 : index
    %c2 = arith.constant 2 : index
    %4 = vector.load %arg1[%c0_5, %c2] : memref<8x792xf32, #tpu.memory_space<vmem>>, vector<8x738xf32>
    %c16 = arith.constant 16 : index
    %c0_6 = arith.constant 0 : index
    %5 = vector.load %arg9[%c16, %c0_6] : memref<72x738xf32, #tpu.memory_space<vmem>>, vector<8x738xf32>
    tpu.vector_store %arg9[%c16, %c0_6], %4 {strides = array<i32>} : memref<72x738xf32, #tpu.memory_space<vmem>>, vector<8x738xf32>,
    %c0_7 = arith.constant 0 : index
    %c18 = arith.constant 18 : index
    %6 = vector.load %arg1[%c0_7, %c18] : memref<8x792xf32, #tpu.memory_space<vmem>>, vector<8x738xf32>
    %c24 = arith.constant 24 : index
    %c0_8 = arith.constant 0 : index
    %7 = vector.load %arg9[%c24, %c0_8] : memref<72x738xf32, #tpu.memory_space<vmem>>, vector<8x738xf32>
    tpu.vector_store %arg9[%c24, %c0_8], %6 {strides = array<i32>} : memref<72x738xf32, #tpu.memory_space<vmem>>, vector<8x738xf32>,
    %c0_9 = arith.constant 0 : index
    %c19 = arith.constant 19 : index
    %8 = vector.load %arg1[%c0_9, %c19] : memref<8x792xf32, #tpu.memory_space<vmem>>, vector<8x738xf32>
    %c32 = arith.constant 32 : index
    %c0_10 = arith.constant 0 : index
    %9 = vector.load %arg9[%c32, %c0_10] : memref<72x738xf32, #tpu.memory_space<vmem>>, vector<8x738xf32>
    tpu.vector_store %arg9[%c32, %c0_10], %8 {strides = array<i32>} : memref<72x738xf32, #tpu.memory_space<vmem>>, vector<8x738xf32>,
    %c0_11 = arith.constant 0 : index
    %c20 = arith.constant 20 : index
    %10 = vector.load %arg1[%c0_11, %c20] : memref<8x792xf32, #tpu.memory_space<vmem>>, vector<8x738xf32>
    %c40 = arith.constant 40 : index
    %c0_12 = arith.constant 0 : index
    %11 = vector.load %arg9[%c40, %c0_12] : memref<72x738xf32, #tpu.memory_space<vmem>>, vector<8x738xf32>
    tpu.vector_store %arg9[%c40, %c0_12], %10 {strides = array<i32>} : memref<72x738xf32, #tpu.memory_space<vmem>>, vector<8x738xf32>,
    %c0_13 = arith.constant 0 : index
    %c36 = arith.constant 36 : index
    %12 = vector.load %arg1[%c0_13, %c36] : memref<8x792xf32, #tpu.memory_space<vmem>>, vector<8x738xf32>
    %c48 = arith.constant 48 : index
    %c0_14 = arith.constant 0 : index
    %13 = vector.load %arg9[%c48, %c0_14] : memref<72x738xf32, #tpu.memory_space<vmem>>, vector<8x738xf32>
    tpu.vector_store %arg9[%c48, %c0_14], %12 {strides = array<i32>} : memref<72x738xf32, #tpu.memory_space<vmem>>, vector<8x738xf32>,
    %c0_15 = arith.constant 0 : index
    %c37 = arith.constant 37 : index
    %14 = vector.load %arg1[%c0_15, %c37] : memref<8x792xf32, #tpu.memory_space<vmem>>, vector<8x738xf32>
    %c56 = arith.constant 56 : index
    %c0_16 = arith.constant 0 : index
    %15 = vector.load %arg9[%c56, %c0_16] : memref<72x738xf32, #tpu.memory_space<vmem>>, vector<8x738xf32>
    tpu.vector_store %arg9[%c56, %c0_16], %14 {strides = array<i32>} : memref<72x738xf32, #tpu.memory_space<vmem>>, vector<8x738xf32>,
    %c0_17 = arith.constant 0 : index
    %c38 = arith.constant 38 : index
    %16 = vector.load %arg1[%c0_17, %c38] : memref<8x792xf32, #tpu.memory_space<vmem>>, vector<8x738xf32>
    %c64 = arith.constant 64 : index
    %c0_18 = arith.constant 0 : index
    %17 = vector.load %arg9[%c64, %c0_18] : memref<72x738xf32, #tpu.memory_space<vmem>>, vector<8x738xf32>
    tpu.vector_store %arg9[%c64, %c0_18], %16 {strides = array<i32>} : memref<72x738xf32, #tpu.memory_space<vmem>>, vector<8x738xf32>,
    %c0_19 = arith.constant 0 : index
    %c0_20 = arith.constant 0 : index
    %18 = vector.load %arg2[%c0_19, %c0_20] : memref<16x72xf32, #tpu.memory_space<vmem>>, vector<16x72xf32>
    %c0_21 = arith.constant 0 : index
    %c0_22 = arith.constant 0 : index
    %19 = vector.load %arg9[%c0_21, %c0_22] : memref<72x738xf32, #tpu.memory_space<vmem>>, vector<72x738xf32>
    %cst = arith.constant dense<0.000000e+00> : vector<16x738xf32>
    %20 = tpu.matmul %18, %19, %cst {dimension_numbers = #tpu.dot_dimension_numbers<[1], [0], [0], [1], [0, 0, 1, 1], [], []>} : vector<16x72xf32>, vector<72x738xf32>, vector<16x738xf32> -> vector<16x738xf32>
    %c0_23 = arith.constant 0 : index
    %c0_24 = arith.constant 0 : index
    %21 = vector.load %arg3[%c0_23, %c0_24] : memref<16x1xf32, #tpu.memory_space<vmem>>, vector<16x1xf32>
    %22 = vector.broadcast %21 : vector<16x1xf32> to vector<16x738xf32>
    %23 = arith.addf %20, %22 : vector<16x738xf32>
    %cst_25 = arith.constant 0.000000e+00 : f32
    %24 = vector.broadcast %cst_25 : f32 to vector<16x738xf32>
    %25 = arith.maximumf %23, %24 : vector<16x738xf32>
    %c0_26 = arith.constant 0 : index
    %c0_27 = arith.constant 0 : index
    %26 = vector.load %arg6[%c0_26, %c0_27] : memref<1x738xf32, #tpu.memory_space<vmem>>, vector<1x738xf32>
    %27 = vector.broadcast %26 : vector<1x738xf32> to vector<16x738xf32>
    %28 = arith.mulf %25, %27 : vector<16x738xf32>
    %29 = vector.extract_strided_slice %28 {offsets = [0, 0], sizes = [16, 684], strides = [1, 1]} : vector<16x738xf32> to vector<16x684xf32>
    %c0_28 = arith.constant 0 : index
    %c0_29 = arith.constant 0 : index
    %30 = vector.load %arg10[%c0_28, %c0_29] : memref<144x684xf32, #tpu.memory_space<vmem>>, vector<16x684xf32>
    tpu.vector_store %arg10[%c0_28, %c0_29], %29 {strides = array<i32>} : memref<144x684xf32, #tpu.memory_space<vmem>>, vector<16x684xf32>,
    %31 = vector.extract_strided_slice %28 {offsets = [0, 1], sizes = [16, 684], strides = [1, 1]} : vector<16x738xf32> to vector<16x684xf32>
    %c16_30 = arith.constant 16 : index
    %c0_31 = arith.constant 0 : index
    %32 = vector.load %arg10[%c16_30, %c0_31] : memref<144x684xf32, #tpu.memory_space<vmem>>, vector<16x684xf32>
    tpu.vector_store %arg10[%c16_30, %c0_31], %31 {strides = array<i32>} : memref<144x684xf32, #tpu.memory_space<vmem>>, vector<16x684xf32>,
    %33 = vector.extract_strided_slice %28 {offsets = [0, 2], sizes = [16, 684], strides = [1, 1]} : vector<16x738xf32> to vector<16x684xf32>
    %c32_32 = arith.constant 32 : index
    %c0_33 = arith.constant 0 : index
    %34 = vector.load %arg10[%c32_32, %c0_33] : memref<144x684xf32, #tpu.memory_space<vmem>>, vector<16x684xf32>
    tpu.vector_store %arg10[%c32_32, %c0_33], %33 {strides = array<i32>} : memref<144x684xf32, #tpu.memory_space<vmem>>, vector<16x684xf32>,
    %35 = vector.extract_strided_slice %28 {offsets = [0, 18], sizes = [16, 684], strides = [1, 1]} : vector<16x738xf32> to vector<16x684xf32>
    %c48_34 = arith.constant 48 : index
    %c0_35 = arith.constant 0 : index
    %36 = vector.load %arg10[%c48_34, %c0_35] : memref<144x684xf32, #tpu.memory_space<vmem>>, vector<16x684xf32>
    tpu.vector_store %arg10[%c48_34, %c0_35], %35 {strides = array<i32>} : memref<144x684xf32, #tpu.memory_space<vmem>>, vector<16x684xf32>,
    %37 = vector.extract_strided_slice %28 {offsets = [0, 19], sizes = [16, 684], strides = [1, 1]} : vector<16x738xf32> to vector<16x684xf32>
    %c64_36 = arith.constant 64 : index
    %c0_37 = arith.constant 0 : index
    %38 = vector.load %arg10[%c64_36, %c0_37] : memref<144x684xf32, #tpu.memory_space<vmem>>, vector<16x684xf32>
    tpu.vector_store %arg10[%c64_36, %c0_37], %37 {strides = array<i32>} : memref<144x684xf32, #tpu.memory_space<vmem>>, vector<16x684xf32>,
    %39 = vector.extract_strided_slice %28 {offsets = [0, 20], sizes = [16, 684], strides = [1, 1]} : vector<16x738xf32> to vector<16x684xf32>
    %c80 = arith.constant 80 : index
    %c0_38 = arith.constant 0 : index
    %40 = vector.load %arg10[%c80, %c0_38] : memref<144x684xf32, #tpu.memory_space<vmem>>, vector<16x684xf32>
    tpu.vector_store %arg10[%c80, %c0_38], %39 {strides = array<i32>} : memref<144x684xf32, #tpu.memory_space<vmem>>, vector<16x684xf32>,
    %41 = vector.extract_strided_slice %28 {offsets = [0, 36], sizes = [16, 684], strides = [1, 1]} : vector<16x738xf32> to vector<16x684xf32>
    %c96 = arith.constant 96 : index
    %c0_39 = arith.constant 0 : index
    %42 = vector.load %arg10[%c96, %c0_39] : memref<144x684xf32, #tpu.memory_space<vmem>>, vector<16x684xf32>
    tpu.vector_store %arg10[%c96, %c0_39], %41 {strides = array<i32>} : memref<144x684xf32, #tpu.memory_space<vmem>>, vector<16x684xf32>,
    %43 = vector.extract_strided_slice %28 {offsets = [0, 37], sizes = [16, 684], strides = [1, 1]} : vector<16x738xf32> to vector<16x684xf32>
    %c112 = arith.constant 112 : index
    %c0_40 = arith.constant 0 : index
    %44 = vector.load %arg10[%c112, %c0_40] : memref<144x684xf32, #tpu.memory_space<vmem>>, vector<16x684xf32>
    tpu.vector_store %arg10[%c112, %c0_40], %43 {strides = array<i32>} : memref<144x684xf32, #tpu.memory_space<vmem>>, vector<16x684xf32>,
    %45 = vector.extract_strided_slice %28 {offsets = [0, 38], sizes = [16, 684], strides = [1, 1]} : vector<16x738xf32> to vector<16x684xf32>
    %c128 = arith.constant 128 : index
    %c0_41 = arith.constant 0 : index
    %46 = vector.load %arg10[%c128, %c0_41] : memref<144x684xf32, #tpu.memory_space<vmem>>, vector<16x684xf32>
    tpu.vector_store %arg10[%c128, %c0_41], %45 {strides = array<i32>} : memref<144x684xf32, #tpu.memory_space<vmem>>, vector<16x684xf32>,
    %c0_42 = arith.constant 0 : index
    %c0_43 = arith.constant 0 : index
    %47 = vector.load %arg4[%c0_42, %c0_43] : memref<16x144xf32, #tpu.memory_space<vmem>>, vector<16x144xf32>
    %c0_44 = arith.constant 0 : index
    %c0_45 = arith.constant 0 : index
    %48 = vector.load %arg10[%c0_44, %c0_45] : memref<144x684xf32, #tpu.memory_space<vmem>>, vector<144x684xf32>
    %cst_46 = arith.constant dense<0.000000e+00> : vector<16x684xf32>
    %49 = tpu.matmul %47, %48, %cst_46 {dimension_numbers = #tpu.dot_dimension_numbers<[1], [0], [0], [1], [0, 0, 1, 1], [], []>} : vector<16x144xf32>, vector<144x684xf32>, vector<16x684xf32> -> vector<16x684xf32>
    %c0_47 = arith.constant 0 : index
    %c0_48 = arith.constant 0 : index
    %50 = vector.load %arg5[%c0_47, %c0_48] : memref<16x1xf32, #tpu.memory_space<vmem>>, vector<16x1xf32>
    %51 = vector.broadcast %50 : vector<16x1xf32> to vector<16x684xf32>
    %52 = arith.addf %49, %51 : vector<16x684xf32>
    %cst_49 = arith.constant 0.000000e+00 : f32
    %53 = vector.broadcast %cst_49 : f32 to vector<16x684xf32>
    %54 = arith.maximumf %52, %53 : vector<16x684xf32>
    %c0_50 = arith.constant 0 : index
    %c0_51 = arith.constant 0 : index
    %55 = vector.load %arg7[%c0_50, %c0_51] : memref<684x128xf32, #tpu.memory_space<vmem>>, vector<684x128xf32>
    %cst_52 = arith.constant dense<0.000000e+00> : vector<16x128xf32>
    %56 = tpu.matmul %54, %55, %cst_52 {dimension_numbers = #tpu.dot_dimension_numbers<[1], [0], [0], [1], [0, 0, 1, 1], [], []>} : vector<16x684xf32>, vector<684x128xf32>, vector<16x128xf32> -> vector<16x128xf32>
    %c0_53 = arith.constant 0 : index
    %c0_54 = arith.constant 0 : index
    %57 = vector.load %arg8[%c0_53, %c0_54] : memref<16x128xf32, #tpu.memory_space<vmem>>, vector<16x128xf32>
    tpu.vector_store %arg8[%c0_53, %c0_54], %56 {strides = array<i32>} : memref<16x128xf32, #tpu.memory_space<vmem>>, vector<16x128xf32>,
    return
  }
  func.func @transform_0(%arg0: i32) -> (i32, i32) {
    %c0_i32 = arith.constant 0 : i32
    %c0_i32_0 = arith.constant 0 : i32
    %c0_i32_1 = arith.constant 0 : i32
    return %c0_i32, %c0_i32_0 : i32, i32
  }
  func.func @transform_1(%arg0: i32) -> (i32, i32) {
    %c0_i32 = arith.constant 0 : i32
    %c0_i32_0 = arith.constant 0 : i32
    %c0_i32_1 = arith.constant 0 : i32
    return %c0_i32, %c0_i32_0 : i32, i32
  }
  func.func @transform_2(%arg0: i32) -> (i32, i32) {
    %c0_i32 = arith.constant 0 : i32
    %c0_i32_0 = arith.constant 0 : i32
    %c0_i32_1 = arith.constant 0 : i32
    return %c0_i32, %c0_i32_0 : i32, i32
  }
  func.func @transform_3(%arg0: i32) -> (i32, i32) {
    %c0_i32 = arith.constant 0 : i32
    %c0_i32_0 = arith.constant 0 : i32
    %c0_i32_1 = arith.constant 0 : i32
    return %c0_i32, %c0_i32_0 : i32, i32
  }
  func.func @transform_4(%arg0: i32) -> (i32, i32) {
    %c0_i32 = arith.constant 0 : i32
    %c0_i32_0 = arith.constant 0 : i32
    %c0_i32_1 = arith.constant 0 : i32
    return %c0_i32, %c0_i32_0 : i32, i32
  }
  func.func @transform_5(%arg0: i32) -> (i32, i32) {
    %c0_i32 = arith.constant 0 : i32
    %c0_i32_0 = arith.constant 0 : i32
    %c0_i32_1 = arith.constant 0 : i32
    return %c0_i32, %c0_i32_0 : i32, i32
  }
  func.func @transform_6(%arg0: i32) -> (i32, i32) {
    %c0_i32 = arith.constant 0 : i32
    %c0_i32_0 = arith.constant 0 : i32
    %c0_i32_1 = arith.constant 0 : i32
    return %c0_i32, %c0_i32_0 : i32, i32
  }
  func.func @transform_7(%arg0: i32) -> (i32, i32) {
    %c0_i32 = arith.constant 0 : i32
    %c0_i32_0 = arith.constant 0 : i32
    %c0_i32_1 = arith.constant 0 : i32
    return %c0_i32, %c0_i32_0 : i32, i32
  }
}

</mosaic_0001>

<bundles_post_ra>
// kernel: tpu_custom_call.1
= control target key start
LH: loop header
LB: loop body
LE: loop exit
PB: predicated region body
PF: predicated region fallthrough
CT: control target
= control target key end

     0   :  { %12 = vsyncpa [#allocation5], 0  ;;  %s2921_s0 = inlined_call_operand.hbm [shape: f32[8,792], index: 0, kind: input, shape index: {}]   ;;  %s2922_s1 = inlined_call_operand.hbm [shape: f32[16,72], index: 1, kind: input, shape index: {}]   ;;  %s2923_s2 = inlined_call_operand.vmem [shape: f32[16,1], index: 2, kind: input, shape index: {}]   ;;  %s2924_s3 = inlined_call_operand.vmem [shape: f32[16,144], index: 3, kind: input, shape index: {}]   ;;  %s2925_s4 = inlined_call_operand.vmem [shape: f32[16,1], index: 4, kind: input, shape index: {}]   ;;  %s2926_s5 = inlined_call_operand.vmem [shape: f32[1,738], index: 5, kind: input, shape index: {}]   ;;  %s2927_s6 = inlined_call_operand.hbm [shape: f32[684,128], index: 6, kind: input, shape index: {}]   ;;  %s2928_s7 = inlined_call_operand.hbm [shape: f32[16,128], index: 7, kind: output, shape index: {}]  }
   0x1   :  { %13 = vsyncpa [#allocation8], 0  ;;  %s30_s26 = sshll.u32 %s2922_s1, 4  ;;  %s31_s26 = int_to_ptr.hbm [resolvable:$true] %s30_s26 }
   0x2   :  { %14 = vsyncpa [#allocation6], 0  ;;  %s1997_s27 = smov [#allocation7]   ;;  %s20_s8 = sshll.u32 %s2921_s0, 4  ;;  %s21_s8 = int_to_ptr.hbm [resolvable:$true] %s20_s8 }
   0x3   :  { %s32_s28 = sshll.u32 %s1997_s27, 4  ;;  %s1998_s9 = smov 128   ;;  %s33_s28 = int_to_ptr.vmem [resolvable:$true] %s32_s28 }
   0x4   :  { %s1999_s10 = smov 8   ;;  %s2000_s11 = smov [#allocation4]  }
   0x5   :  { %38 = dma.hbm_to_vmem [thread:$0]  %s31_s26, 256, %s33_s28, [#allocation8], %s1998_s9, %s1998_s9, %s1999_s10  }
   0x6   :  { %s22_s12 = sshll.u32 %s2000_s11, 4  ;;  %s51_s14 = sshll.u32 %s2927_s6, 4  ;;  %s23_s12 = int_to_ptr.vmem [resolvable:$true] %s22_s12  ;;  %s52_s14 = int_to_ptr.hbm [resolvable:$true] %s51_s14 }
   0x7   :  { %25 = dma.hbm_to_vmem [thread:$0]  %s21_s8, 896, %s23_s12, [#allocation5]  }
   0x8   :  { %s2001_s15 = smov [#allocation9]  }
   0x9   :  { %s53_s16 = sshll.u32 %s2001_s15, 4  ;;  %s54_s16 = int_to_ptr.vmem [resolvable:$true] %s53_s16 }
   0xa   :  { %59 = dma.hbm_to_vmem [thread:$0]  %s52_s14, 11008, %s54_s16, [#allocation8], %s1998_s9, %s1998_s9, %s1999_s10  }
   0xb   :  { %1991 = dma.done.wait [#allocation5], 896  }
   0xc   :  { %1992 = vsyncadd [#allocation5], 4294966400 }
   0xd   :  { %1993 = dma.done.wait [#allocation8], 11264  }
   0xe   :  { %1994 = vsyncadd [#allocation8], 4294956032  ;;  %v2067_v0 = vld [vmem:[#allocation4 + $0x10] sm:$0xff]  ;;  %v2069_v1 = vld [vmem:[#allocation4] sm:$0xff]  ;;  %s2002_s0 = smov 90   ;;  %s2003_s6 = smov 91  }
   0xf   :  { %v2071_v2 = vld [vmem:[#allocation4 + $0x8] sm:$0xff]  ;;  %407 = vrot.lane.b32.xlu1 %v2067_v0, %s2002_s0  ;;  %403 = vrot.lane.b32.xlu0 %v2069_v1, %s2002_s0  ;;  %s2004_s17 = smov 92   ;;  %s2005_s18 = smov 108   ;;  %v2097_v3 = vld [vmem:[#allocation4 + $0x18] sm:$0xff]  ;;  %v2105_v4 = vld [vmem:[#allocation4 + $0x20] sm:$0xff]  ;;  %vm370_vm0 = vcmask 744448  }
  0x10   :  { %358 = vrot.lane.b32.xlu2 %v2071_v2, %s2003_s6  ;;  %s2006_s19 = smov 109   ;;  %s2007_s20 = smov 110   ;;  %v2149_v6 = vld [vmem:[#allocation4 + $0x28] sm:$0xff]  ;;  %v395_v13 = vld [vmem:[#allocation4 + $0x30] sm:$0xff]  ;;  %vm417_vm1 = vcmask 736256   ;;  %vm323_vm2 = vcmask 752640  }
  0x11   :  { %s2008_s21 = smov 126   ;;  %s2009_s22 = smov 127   ;;  %vm277_vm3 = vcmask 883712   ;;  %vm235_vm4 = vcmask 891904   ;;  %vm193_vm5 = vcmask 900096   ;;  %v2010_v40 = vmov 0  }
  0x12   :  { %1894 = vset.pattern.permute.xlu1 %v2010_v40  ;;  %v492_v41 = vld [vmem:[%s2923_s2] sm:$0xff]  ;;  %1893 = vset.pattern.permute.xlu0 %v2010_v40  ;;  %vm151_vm6 = vcmask 1031168   ;;  %vm109_vm7 = vcmask 1039360   ;;  %v2222_v54 = vld [vmem:[#allocation7] sm:$0xff]  ;;  %vm504_vm8 = vcmask 588800   ;;  %vm83_vm9 = vcmask 801792  }
  0x13   :  { %84 = vst.msk [vmem:[#allocation2 + $0x28] sm:$0xff] %vm83_vm9, %v2149_v6  ;;  %vm692_vm10 = vcmask 359424   ;;  %vm1300_vm11 = vcmask 130048   ;;  %vm1687_vm12 = vcmask 1043456  }
  0x17   :  { %405 = vrot.lane.b32.xlu0 %v2071_v2, %s2002_s0  ;;  %356 = vrot.lane.b32.xlu1 %v2069_v1, %s2003_s6 }
  0x18   :  { %360 = vrot.lane.b32.xlu2 %v2067_v0, %s2003_s6 }
  0x1f   :  { %311 = vrot.lane.b32.xlu1 %v2071_v2, %s2004_s17  ;;  %309 = vrot.lane.b32.xlu0 %v2069_v1, %s2004_s17 }
  0x20   :  { %313 = vrot.lane.b32.xlu2 %v2067_v0, %s2004_s17 }
  0x27   :  { %267 = vrot.lane.b32.xlu1 %v2071_v2, %s2005_s18  ;;  %265 = vrot.lane.b32.xlu0 %v2069_v1, %s2005_s18 }
  0x28   :  { %269 = vrot.lane.b32.xlu2 %v2067_v0, %s2005_s18 }
  0x2f   :  { %225 = vrot.lane.b32.xlu1 %v2071_v2, %s2006_s19  ;;  %223 = vrot.lane.b32.xlu0 %v2069_v1, %s2006_s19 }
  0x30   :  { %227 = vrot.lane.b32.xlu2 %v2067_v0, %s2006_s19 }
  0x37   :  { %183 = vrot.lane.b32.xlu1 %v2071_v2, %s2007_s20  ;;  %181 = vrot.lane.b32.xlu0 %v2069_v1, %s2007_s20 }
  0x38   :  { %185 = vrot.lane.b32.xlu2 %v2067_v0, %s2007_s20 }
  0x3f   :  { %141 = vrot.lane.b32.xlu1 %v2071_v2, %s2008_s21  ;;  %139 = vrot.lane.b32.xlu0 %v2069_v1, %s2008_s21 }
  0x40   :  { %143 = vrot.lane.b32.xlu2 %v2067_v0, %s2008_s21 }
  0x47   :  { %99 = vrot.lane.b32.xlu1 %v2071_v2, %s2009_s22  ;;  %97 = vrot.lane.b32.xlu0 %v2069_v1, %s2009_s22 }
  0x48   :  { %101 = vrot.lane.b32.xlu2 %v2067_v0, %s2009_s22 }
  0x4f   :  { %362 = vrot.lane.b32.xlu1 %v2097_v3, %s2003_s6  ;;  %409 = vrot.lane.b32.xlu0 %v2097_v3, %s2002_s0 }
  0x50   :  { %315 = vrot.lane.b32.xlu2 %v2097_v3, %s2004_s17 }
  0x57   :  { %229 = vrot.lane.b32.xlu1 %v2097_v3, %s2006_s19  ;;  %271 = vrot.lane.b32.xlu0 %v2097_v3, %s2005_s18 }
  0x58   :  { %411 = vrot.lane.b32.xlu2 %v2105_v4, %s2002_s0 }
  0x5f   :  { %364 = vrot.lane.b32.xlu1 %v2105_v4, %s2003_s6  ;;  %187 = vrot.lane.b32.xlu0 %v2097_v3, %s2007_s20 }
  0x60   :  { %145 = vrot.lane.b32.xlu2 %v2097_v3, %s2008_s21 }
  0x67   :  { %103 = vrot.lane.b32.xlu1 %v2097_v3, %s2009_s22  ;;  %317 = vrot.lane.b32.xlu0 %v2105_v4, %s2004_s17 }
  0x68   :  { %273 = vrot.lane.b32.xlu2 %v2105_v4, %s2005_s18 }
  0x6a   :  { %v359_v5 = vpop.permute.xlu2 %358 }
  0x6f   :  { %231 = vrot.lane.b32.xlu1 %v2105_v4, %s2006_s19  ;;  %413 = vrot.lane.b32.xlu0 %v2149_v6, %s2002_s0 }
  0x70   :  { %366 = vrot.lane.b32.xlu2 %v2149_v6, %s2003_s6 }
  0x72   :  { %v2157_v7 = vpop.permute.xlu2 %360 }
  0x73   :  { %v372_v8 = vsel %vm370_vm0, %v359_v5, %v2157_v7 }
  0x77   :  { %319 = vrot.lane.b32.xlu1 %v2149_v6, %s2004_s17  ;;  %189 = vrot.lane.b32.xlu0 %v2105_v4, %s2007_s20 }
  0x78   :  { %147 = vrot.lane.b32.xlu2 %v2105_v4, %s2008_s21 }
  0x7a   :  { %v314_v9 = vpop.permute.xlu2 %313 }
  0x7f   :  { %105 = vrot.lane.b32.xlu1 %v2105_v4, %s2009_s22  ;;  %275 = vrot.lane.b32.xlu0 %v2149_v6, %s2005_s18 }
  0x80   :  { %233 = vrot.lane.b32.xlu2 %v2149_v6, %s2006_s19 }
  0x81   :  { %v2173_v10 = vpop.permute.xlu1 %407  ;;  %v404_v11 = vpop.permute.xlu0 %403 }
  0x82   :  { %v2175_v12 = vpop.permute.xlu2 %269 }
  0x87   :  { %191 = vrot.lane.b32.xlu1 %v2149_v6, %s2007_s20  ;;  %415 = vrot.lane.b32.xlu0 %v395_v13, %s2002_s0 }
  0x88   :  { %368 = vrot.lane.b32.xlu2 %v395_v13, %s2003_s6 }
  0x89   :  { %v406_v14 = vpop.permute.xlu0 %405  ;;  %v357_v15 = vpop.permute.xlu1 %356 }
  0x8a   :  { %v418_v16 = vsel %vm417_vm1, %v404_v11, %v406_v14  ;;  %v419_v17 = vsel %vm417_vm1, %v406_v14, %v2173_v10  ;;  %v371_v18 = vsel %vm370_vm0, %v357_v15, %v359_v5  ;;  %v2185_v19 = vpop.permute.xlu2 %227 }
  0x8b   :  { %518 = vmatpush.msra.mxu0 %v418_v16  ;;  %541 = vmatpush.msra.mxu1 %v419_v17 }
  0x8d   :  { %519 = vmatpush.msra.mxu0 %v371_v18  ;;  %542 = vmatpush.msra.mxu1 %v372_v8  ;;  %v2262_v18 = vld [vmem:[#allocation7 + $0x8] sm:$0xff] }
  0x8f   :  { %321 = vrot.lane.b32.xlu1 %v395_v13, %s2004_s17  ;;  %149 = vrot.lane.b32.xlu0 %v2149_v6, %s2008_s21 }
  0x90   :  { %107 = vrot.lane.b32.xlu2 %v2149_v6, %s2009_s22 }
  0x91   :  { %v312_v20 = vpop.permute.xlu1 %311  ;;  %v310_v21 = vpop.permute.xlu0 %309 }
  0x92   :  { %v325_v22 = vsel %vm323_vm2, %v312_v20, %v314_v9  ;;  %v324_v23 = vsel %vm323_vm2, %v310_v21, %v312_v20  ;;  %v2194_v24 = vpop.permute.xlu2 %185 }
  0x93   :  { %520 = vmatpush.msra.mxu0 %v324_v23  ;;  %543 = vmatpush.msra.mxu1 %v325_v22 }
  0x97   :  { %496 = vperm.xlu1 %1894, %v492_v41  }
  0x99   :  { %v268_v25 = vpop.permute.xlu1 %267  ;;  %v266_v26 = vpop.permute.xlu0 %265 }
  0x9a   :  { %v279_v27 = vsel %vm277_vm3, %v268_v25, %v2175_v12  ;;  %v278_v28 = vsel %vm277_vm3, %v266_v26, %v268_v25  ;;  %v144_v29 = vpop.permute.xlu2 %143 }
  0x9b   :  { %521 = vmatpush.msra.mxu0 %v278_v28  ;;  %544 = vmatpush.msra.mxu1 %v279_v27 }
  0xa1   :  { %v226_v30 = vpop.permute.xlu1 %225  ;;  %v224_v31 = vpop.permute.xlu0 %223 }
  0xa2   :  { %v237_v32 = vsel %vm235_vm4, %v226_v30, %v2185_v19  ;;  %v236_v33 = vsel %vm235_vm4, %v224_v31, %v226_v30  ;;  %v2202_v34 = vpop.permute.xlu2 %101  ;;  %v493_v30 = vld [vmem:[%s2923_s2 + $0x8] sm:$0xff] }
  0xa3   :  { %522 = vmatpush.msra.mxu0 %v236_v33  ;;  %545 = vmatpush.msra.mxu1 %v237_v32 }
  0xa4   :  { %501 = vperm.xlu0 %1893, %v493_v30  }
  0xa9   :  { %v184_v35 = vpop.permute.xlu1 %183  ;;  %v182_v36 = vpop.permute.xlu0 %181 }
  0xaa   :  { %v195_v37 = vsel %vm193_vm5, %v184_v35, %v2194_v24  ;;  %v194_v38 = vsel %vm193_vm5, %v182_v36, %v184_v35  ;;  %v2207_v39 = vpop.permute.xlu2 %315 }
  0xab   :  { %v326_v42 = vsel %vm323_vm2, %v314_v9, %v2207_v39  ;;  %523 = vmatpush.msra.mxu0 %v194_v38  ;;  %546 = vmatpush.msra.mxu1 %v195_v37 }
  0xb1   :  { %v142_v43 = vpop.permute.xlu1 %141  ;;  %v140_v44 = vpop.permute.xlu0 %139 }
  0xb2   :  { %v153_v45 = vsel %vm151_vm6, %v142_v43, %v144_v29  ;;  %v152_v46 = vsel %vm151_vm6, %v140_v44, %v142_v43  ;;  %v2216_v47 = vpop.permute.xlu2 %411 }
  0xb3   :  { %524 = vmatpush.msra.mxu0 %v152_v46  ;;  %547 = vmatpush.msra.mxu1 %v153_v45 }
  0xb9   :  { %v100_v48 = vpop.permute.xlu1 %99  ;;  %v98_v49 = vpop.permute.xlu0 %97 }
  0xba   :  { %v146_v50 = vpop.permute.xlu2 %145  ;;  %v111_v51 = vsel %vm109_vm7, %v100_v48, %v2202_v34  ;;  %v110_v52 = vsel %vm109_vm7, %v98_v49, %v100_v48 }
  0xbb   :  { %v154_v53 = vsel %vm151_vm6, %v144_v29, %v146_v50  ;;  %525 = vmatpush.msra.mxu0 %v110_v52  ;;  %548 = vmatpush.msra.mxu1 %v111_v51  ;;  %v443_v51 = vld [vmem:[#allocation2 + $0x28] sm:$0xff]  ;;  %v2315_v52 = vld [vmem:[%s2926_s5] sm:$0x3f] }
  0xbc   :  { %v667_v30 = vperm.slane %v2315_v52, 4 }
  0xbd   :  { %526 = vmatpush.msra.mxu0 %v2069_v1  ;;  %549 = vmatpush.msra.mxu1 %v2071_v2 }
  0xbe   :  { %1851 = vmatmul.msk.f32.vlgmr.msra.gmra.mxu0 %vm504_vm8, %v2222_v54  ;;  %1853 = vmatmul.msk.f32.vlgmr.msra.gmra.mxu1 %vm504_vm8, %v2222_v54 }
  0xc1   :  { %v363_v55 = vpop.permute.xlu1 %362  ;;  %v410_v56 = vpop.permute.xlu0 %409 }
  0xc2   :  { %v373_v57 = vsel %vm370_vm0, %v2157_v7, %v363_v55  ;;  %v420_v58 = vsel %vm417_vm1, %v2173_v10, %v410_v56  ;;  %v421_v59 = vsel %vm417_vm1, %v410_v56, %v2216_v47  ;;  %v2238_v60 = vpop.permute.xlu2 %273 }
  0xc3   :  { %564 = vmatpush.msra.mxu2 %v420_v58  ;;  %587 = vmatpush.msra.mxu3 %v421_v59 }
  0xc5   :  { %565 = vmatpush.msra.mxu2 %v373_v57  ;;  %v663_v57 = vperm.slane %v2315_v52, 0 }
  0xc6   :  { %1852 = vmatmul.msk.f32.gmra.mxu0 %vm504_vm8, %v2262_v18  ;;  %1854 = vmatmul.msk.f32.gmra.mxu1 %vm504_vm8, %v2262_v18 }
  0xc7   :  { %566 = vmatpush.msra.mxu2 %v326_v42 }
  0xc9   :  { %v230_v61 = vpop.permute.xlu1 %229  ;;  %v272_v62 = vpop.permute.xlu0 %271 }
  0xca   :  { %v238_v63 = vsel %vm235_vm4, %v2185_v19, %v230_v61  ;;  %v280_v1 = vsel %vm277_vm3, %v2175_v12, %v272_v62  ;;  %v281_v2 = vsel %vm277_vm3, %v272_v62, %v2238_v60  ;;  %v367_v5 = vpop.permute.xlu2 %366 }
  0xcb   :  { %567 = vmatpush.msra.mxu2 %v280_v1 }
  0xcd   :  { %568 = vmatpush.msra.mxu2 %v238_v63 }
  0xd1   :  { %v365_v6 = vpop.permute.xlu1 %364  ;;  %v188_v7 = vpop.permute.xlu0 %187 }
  0xd2   :  { %v374_v8 = vsel %vm370_vm0, %v363_v55, %v365_v6  ;;  %v375_v9 = vsel %vm370_vm0, %v365_v6, %v367_v5  ;;  %v196_v10 = vsel %vm193_vm5, %v2194_v24, %v188_v7  ;;  %v2250_v11 = vpop.permute.xlu2 %147 }
  0xd3   :  { %v155_v12 = vsel %vm151_vm6, %v146_v50, %v2250_v11  ;;  %569 = vmatpush.msra.mxu2 %v196_v10  ;;  %588 = vmatpush.msra.mxu3 %v374_v8 }
  0xd5   :  { %570 = vmatpush.msra.mxu2 %v154_v53 }
  0xd9   :  { %v104_v13 = vpop.permute.xlu1 %103  ;;  %v318_v14 = vpop.permute.xlu0 %317 }
  0xda   :  { %v112_v15 = vsel %vm109_vm7, %v2202_v34, %v104_v13  ;;  %v327_v16 = vsel %vm323_vm2, %v2207_v39, %v318_v14  ;;  %v234_v17 = vpop.permute.xlu2 %233 }
  0xdb   :  { %571 = vmatpush.msra.mxu2 %v112_v15  ;;  %589 = vmatpush.msra.mxu3 %v327_v16  ;;  %252 = vst.msk [vmem:[#allocation2 + $0xe8] sm:$0xff] %vm83_vm9, %v234_v17 }
  0xdd   :  { %572 = vmatpush.msra.mxu2 %v2067_v0  ;;  %590 = vmatpush.msra.mxu3 %v281_v2 }
  0xde   :  { %1855 = vmatmul.msk.f32.vlgmr.msra.gmra.mxu2 %vm504_vm8, %v2222_v54 }
  0xe1   :  { %v232_v19 = vpop.permute.xlu1 %231  ;;  %v414_v20 = vpop.permute.xlu0 %413 }
  0xe2   :  { %v239_v21 = vsel %vm235_vm4, %v230_v61, %v232_v19  ;;  %v240_v22 = vsel %vm235_vm4, %v232_v19, %v234_v17  ;;  %v422_v0 = vsel %vm417_vm1, %v2216_v47, %v414_v20  ;;  %v369_v23 = vpop.permute.xlu2 %368  ;;  %v467_v47 = vld [vmem:[#allocation2 + $0xe8] sm:$0xff] }
  0xe3   :  { %v376_v24 = vsel %vm370_vm0, %v367_v5, %v369_v23  ;;  %591 = vmatpush.msra.mxu3 %v239_v21  ;;  %610 = vmatpush.msrb.mxu0 %v422_v0  ;;  %v665_v5 = vperm.slane %v2315_v52, 2 }
  0xe4   :  { %388 = vst.msk [vmem:[#allocation2 + $0x178] sm:$0xff] %vm83_vm9, %v376_v24 }
  0xe5   :  { %611 = vmatpush.msrb.mxu0 %v375_v9 }
  0xe6   :  { %1856 = vmatmul.msk.f32.gmra.mxu2 %vm504_vm8, %v2262_v18 }
  0xe9   :  { %v320_v25 = vpop.permute.xlu1 %319  ;;  %v190_v26 = vpop.permute.xlu0 %189 }
  0xea   :  { %v328_v27 = vsel %vm323_vm2, %v318_v14, %v320_v25  ;;  %v197_v28 = vsel %vm193_vm5, %v188_v7, %v190_v26  ;;  %v108_v29 = vpop.permute.xlu2 %107 }
  0xeb   :  { %592 = vmatpush.msra.mxu3 %v197_v28  ;;  %612 = vmatpush.msrb.mxu0 %v328_v27  ;;  %126 = vst.msk [vmem:[#allocation2 + $0x58] sm:$0xff] %vm83_vm9, %v108_v29  ;;  %v485_v44 = vld [vmem:[#allocation2 + $0x178] sm:$0xff] }
  0xed   :  { %593 = vmatpush.msra.mxu3 %v155_v12 }
  0xf1   :  { %v106_v31 = vpop.permute.xlu1 %105  ;;  %v276_v32 = vpop.permute.xlu0 %275 }
  0xf2   :  { %v113_v33 = vsel %vm109_vm7, %v104_v13, %v106_v31  ;;  %v114_v34 = vsel %vm109_vm7, %v106_v31, %v108_v29  ;;  %v282_v35 = vsel %vm277_vm3, %v2238_v60, %v276_v32  ;;  %294 = vst.msk [vmem:[#allocation2 + $0x118] sm:$0xff] %vm83_vm9, %v276_v32  ;;  %v449_v50 = vld [vmem:[#allocation2 + $0x58] sm:$0xff] }
  0xf3   :  { %594 = vmatpush.msra.mxu3 %v113_v33  ;;  %613 = vmatpush.msrb.mxu0 %v282_v35 }
  0xf5   :  { %595 = vmatpush.msra.mxu3 %v2097_v3  ;;  %614 = vmatpush.msrb.mxu0 %v240_v22  ;;  %v666_v22 = vperm.slane %v2315_v52, 3 }
  0xf6   :  { %1857 = vmatmul.msk.f32.vlgmr.msra.gmra.mxu3 %vm504_vm8, %v2222_v54 }
  0xf9   :  { %v192_v36 = vpop.permute.xlu1 %191  ;;  %v416_v37 = vpop.permute.xlu0 %415  ;;  %v473_v46 = vld [vmem:[#allocation2 + $0x118] sm:$0xff] }
  0xfa   :  { %v198_v38 = vsel %vm193_vm5, %v190_v26, %v192_v36  ;;  %210 = vst.msk [vmem:[#allocation2 + $0xb8] sm:$0xff] %vm83_vm9, %v192_v36  ;;  %v423_v39 = vsel %vm417_vm1, %v414_v20, %v416_v37 }
  0xfb   :  { %615 = vmatpush.msrb.mxu0 %v198_v38  ;;  %435 = vst.msk [vmem:[#allocation2 + $0x1a8] sm:$0xff] %vm83_vm9, %v423_v39  ;;  %v668_v39 = vperm.slane %v2315_v52, 5 }
  0xfe   :  { %1858 = vmatmul.msk.f32.gmra.mxu3 %vm504_vm8, %v2262_v18 }
 0x101   :  { %v322_v40 = vpop.permute.xlu1 %321  ;;  %v150_v3 = vpop.permute.xlu0 %149  ;;  %v461_v48 = vld [vmem:[#allocation2 + $0xb8] sm:$0xff] }
 0x102   :  { %v329_v41 = vsel %vm323_vm2, %v320_v25, %v322_v40  ;;  %v156_v42 = vsel %vm151_vm6, %v2250_v11, %v150_v3  ;;  %168 = vst.msk [vmem:[#allocation2 + $0x88] sm:$0xff] %vm83_vm9, %v150_v3  ;;  %v491_v43 = vld [vmem:[#allocation2 + $0x1a8] sm:$0xff] }
 0x103   :  { %341 = vst.msk [vmem:[#allocation2 + $0x148] sm:$0xff] %vm83_vm9, %v329_v41  ;;  %616 = vmatpush.msrb.mxu0 %v156_v42  ;;  %633 = vmatpush.msrb.mxu1 %v491_v43 }
 0x105   :  { %617 = vmatpush.msrb.mxu0 %v114_v34  ;;  %634 = vmatpush.msrb.mxu1 %v485_v44 }
 0x107   :  { %618 = vmatpush.msrb.mxu0 %v2105_v4 }
 0x108   :  { %1859 = vmatmul.msk.f32.vlgmr.msrb.gmra.mxu0 %vm504_vm8, %v2222_v54 }
 0x109   :  { %v455_v49 = vld [vmem:[#allocation2 + $0x88] sm:$0xff]  ;;  %v2310_v4 = vpop.permute.xlu1 %496 }
 0x10a   :  { %v479_v45 = vld [vmem:[#allocation2 + $0x148] sm:$0xff] }
 0x10b   :  { %635 = vmatpush.msrb.mxu1 %v479_v45 }
 0x10d   :  { %636 = vmatpush.msrb.mxu1 %v473_v46 }
 0x10f   :  { %637 = vmatpush.msrb.mxu1 %v467_v47 }
 0x110   :  { %1860 = vmatmul.msk.f32.gmra.mxu0 %vm504_vm8, %v2262_v18 }
 0x111   :  { %638 = vmatpush.msrb.mxu1 %v461_v48 }
 0x113   :  { %639 = vmatpush.msrb.mxu1 %v455_v49 }
 0x115   :  { %640 = vmatpush.msrb.mxu1 %v449_v50 }
 0x116   :  { %v2357_v7 = vpop.permute.xlu0 %501 }
 0x117   :  { %641 = vmatpush.msrb.mxu1 %v443_v51 }
 0x118   :  { %1861 = vmatmul.msk.f32.vlgmr.msrb.gmra.mxu1 %vm504_vm8, %v2222_v54  ;;  %v664_v54 = vperm.slane %v2315_v52, 1 }
 0x120   :  { %1862 = vmatmul.msk.f32.gmra.mxu1 %vm504_vm8, %v2262_v18 }
 0x13b   :  { %v528_v53 = vpop.f32.mrf.mxu0  ;;  %v551_v55 = vpop.f32.mrf.mxu1 }
 0x13c   :  { %v529_v56 = vadd.f32 %v528_v53, %v2310_v4  ;;  %v552_v58 = vadd.f32 %v551_v55, %v2310_v4 }
 0x13e   :  { %v649_v59 = vmax.f32 %v529_v56, 0.0  ;;  %v650_v60 = vmax.f32 %v552_v58, 0.0 }
 0x140   :  { %v2321_v61 = vmul.f32 %v663_v57, %v649_v59  ;;  %v2323_v62 = vmul.f32 %v664_v54, %v650_v60 }
 0x142   :  { %1004 = vrot.lane.b32.xlu1 %v2323_v62, %s2004_s17  ;;  %1062 = vrot.lane.b32.xlu0 %v2323_v62, %s2003_s6 }
 0x143   :  { %1060 = vrot.lane.b32.xlu2 %v2321_v61, %s2003_s6  ;;  %v554_v1 = vpop.f32.mrf.mxu1  ;;  %v531_v6 = vpop.f32.mrf.mxu0 }
 0x144   :  { %v532_v9 = vadd.f32 %v531_v6, %v2357_v7  ;;  %v555_v10 = vadd.f32 %v554_v1, %v2357_v7 }
 0x146   :  { %v655_v12 = vmax.f32 %v532_v9, 0.0  ;;  %v656_v13 = vmax.f32 %v555_v10, 0.0 }
 0x148   :  { %v2364_v14 = vmul.f32 %v663_v57, %v655_v12  ;;  %v2366_v15 = vmul.f32 %v664_v54, %v656_v13 }
 0x14a   :  { %944 = vrot.lane.b32.xlu1 %v2321_v61, %s2005_s18  ;;  %1002 = vrot.lane.b32.xlu0 %v2321_v61, %s2004_s17 }
 0x14b   :  { %946 = vrot.lane.b32.xlu2 %v2323_v62, %s2005_s18 }
 0x152   :  { %830 = vrot.lane.b32.xlu1 %v2323_v62, %s2007_s20  ;;  %888 = vrot.lane.b32.xlu0 %v2323_v62, %s2006_s19 }
 0x153   :  { %886 = vrot.lane.b32.xlu2 %v2321_v61, %s2006_s19 }
 0x15a   :  { %770 = vrot.lane.b32.xlu1 %v2321_v61, %s2008_s21  ;;  %828 = vrot.lane.b32.xlu0 %v2321_v61, %s2007_s20 }
 0x15b   :  { %772 = vrot.lane.b32.xlu2 %v2323_v62, %s2008_s21 }
 0x161   :  { %v574_v63 = vpop.f32.mrf.mxu2 }
 0x162   :  { %v575_v2 = vadd.f32 %v574_v63, %v2310_v4  ;;  %1120 = vrot.lane.b32.xlu1 %v2323_v62, %s2002_s0  ;;  %714 = vrot.lane.b32.xlu0 %v2323_v62, %s2009_s22 }
 0x163   :  { %712 = vrot.lane.b32.xlu2 %v2321_v61, %s2009_s22 }
 0x164   :  { %v651_v8 = vmax.f32 %v575_v2, 0.0 }
 0x166   :  { %v2361_v11 = vmul.f32 %v665_v5, %v651_v8 }
 0x168   :  { %689 = vst [vmem:[#allocation3 + $0x10] sm:$0xff] %v2361_v11 }
 0x169   :  { %v577_v16 = vpop.f32.mrf.mxu2 }
 0x16a   :  { %1006 = vrot.lane.b32.xlu1 %v2361_v11, %s2004_s17  ;;  %1118 = vrot.lane.b32.xlu0 %v2321_v61, %s2002_s0  ;;  %v578_v17 = vadd.f32 %v577_v16, %v2357_v7 }
 0x16b   :  { %1064 = vrot.lane.b32.xlu2 %v2361_v11, %s2003_s6 }
 0x16c   :  { %v657_v18 = vmax.f32 %v578_v17, 0.0 }
 0x16e   :  { %v2375_v19 = vmul.f32 %v665_v5, %v657_v18 }
 0x170   :  { %696 = vst [vmem:[#allocation3 + $0x40] sm:$0xff] %v2375_v19 }
 0x173   :  { %948 = vrot.lane.b32.xlu2 %v2361_v11, %s2005_s18 }
 0x179   :  { %v597_v20 = vpop.f32.mrf.mxu3 }
 0x17a   :  { %v598_v21 = vadd.f32 %v597_v20, %v2310_v4 }
 0x17b   :  { %1122 = vrot.lane.b32.xlu2 %v2361_v11, %s2002_s0 }
 0x17c   :  { %v652_v0 = vmax.f32 %v598_v21, 0.0 }
 0x17e   :  { %v2384_v23 = vmul.f32 %v666_v22, %v652_v0 }
 0x180   :  { %690 = vst [vmem:[#allocation3 + $0x18] sm:$0xff] %v2384_v23  ;;  %1008 = vrot.lane.b32.xlu1 %v2384_v23, %s2004_s17  ;;  %1066 = vrot.lane.b32.xlu0 %v2384_v23, %s2003_s6 }
 0x181   :  { %v600_v24 = vpop.f32.mrf.mxu3 }
 0x182   :  { %v601_v25 = vadd.f32 %v600_v24, %v2357_v7 }
 0x183   :  { %832 = vrot.lane.b32.xlu2 %v2361_v11, %s2007_s20 }
 0x184   :  { %v658_v26 = vmax.f32 %v601_v25, 0.0 }
 0x185   :  { %v620_v27 = vpop.f32.mrf.mxu0 }
 0x186   :  { %v2394_v28 = vmul.f32 %v666_v22, %v658_v26  ;;  %v621_v29 = vadd.f32 %v620_v27, %v2310_v4 }
 0x188   :  { %697 = vst [vmem:[#allocation3 + $0x48] sm:$0xff] %v2394_v28  ;;  %v653_v31 = vmax.f32 %v621_v29, 0.0  ;;  %1074 = vrot.lane.b32.xlu1 %v2366_v15, %s2003_s6  ;;  %890 = vrot.lane.b32.xlu0 %v2361_v11, %s2006_s19 }
 0x18a   :  { %v2403_v32 = vmul.f32 %v667_v30, %v653_v31 }
 0x18b   :  { %1072 = vrot.lane.b32.xlu2 %v2364_v14, %s2003_s6 }
 0x18c   :  { %691 = vst [vmem:[#allocation3 + $0x20] sm:$0xff] %v2403_v32 }
 0x18d   :  { %v623_v33 = vpop.f32.mrf.mxu0 }
 0x18e   :  { %v624_v34 = vadd.f32 %v623_v33, %v2357_v7 }
 0x190   :  { %v659_v35 = vmax.f32 %v624_v34, 0.0  ;;  %1014 = vrot.lane.b32.xlu1 %v2364_v14, %s2004_s17  ;;  %1124 = vrot.lane.b32.xlu0 %v2384_v23, %s2002_s0 }
 0x192   :  { %v2413_v36 = vmul.f32 %v667_v30, %v659_v35 }
 0x193   :  { %1016 = vrot.lane.b32.xlu2 %v2366_v15, %s2004_s17 }
 0x194   :  { %698 = vst [vmem:[#allocation3 + $0x50] sm:$0xff] %v2413_v36 }
 0x195   :  { %v643_v37 = vpop.f32.mrf.mxu1 }
 0x196   :  { %v644_v38 = vadd.f32 %v643_v37, %v2310_v4 }
 0x198   :  { %v654_v40 = vmax.f32 %v644_v38, 0.0  ;;  %900 = vrot.lane.b32.xlu1 %v2366_v15, %s2006_s19  ;;  %950 = vrot.lane.b32.xlu0 %v2384_v23, %s2005_s18 }
 0x19a   :  { %v2424_v3 = vmul.f32 %v668_v39, %v654_v40 }
 0x19b   :  { %956 = vrot.lane.b32.xlu2 %v2364_v14, %s2005_s18 }
 0x19c   :  { %693 = vst.msk [vmem:[#allocation3 + $0x28] sm:$0xff] %vm692_vm10, %v2424_v3 }
 0x19d   :  { %v646_v41 = vpop.f32.mrf.mxu1  ;;  %v1061_v42 = vpop.permute.xlu2 %1060 }
 0x19e   :  { %v647_v43 = vadd.f32 %v646_v41, %v2357_v7 }
 0x1a0   :  { %v660_v44 = vmax.f32 %v647_v43, 0.0  ;;  %840 = vrot.lane.b32.xlu1 %v2364_v14, %s2007_s20  ;;  %958 = vrot.lane.b32.xlu0 %v2366_v15, %s2005_s18 }
 0x1a2   :  { %v2435_v45 = vmul.f32 %v668_v39, %v660_v44 }
 0x1a3   :  { %842 = vrot.lane.b32.xlu2 %v2366_v15, %s2007_s20 }
 0x1a4   :  { %699 = vst.msk [vmem:[#allocation3 + $0x58] sm:$0xff] %vm692_vm10, %v2435_v45 }
 0x1a5   :  { %v947_v46 = vpop.permute.xlu2 %946 }
 0x1a8   :  { %726 = vrot.lane.b32.xlu1 %v2366_v15, %s2009_s22  ;;  %898 = vrot.lane.b32.xlu0 %v2364_v14, %s2006_s19 }
 0x1ab   :  { %782 = vrot.lane.b32.xlu2 %v2364_v14, %s2008_s21 }
 0x1ad   :  { %v887_v47 = vpop.permute.xlu2 %886 }
 0x1b0   :  { %1076 = vrot.lane.b32.xlu1 %v2375_v19, %s2003_s6  ;;  %784 = vrot.lane.b32.xlu0 %v2366_v15, %s2008_s21 }
 0x1b3   :  { %1130 = vrot.lane.b32.xlu2 %v2364_v14, %s2002_s0 }
 0x1b4   :  { %v1005_v48 = vpop.permute.xlu1 %1004  ;;  %v1063_v49 = vpop.permute.xlu0 %1062 }
 0x1b5   :  { %v2454_v50 = vsel %vm370_vm0, %v1061_v42, %v1063_v49  ;;  %v2456_v51 = vpop.permute.xlu2 %772 }
 0x1b8   :  { %1134 = vrot.lane.b32.xlu1 %v2375_v19, %s2002_s0  ;;  %724 = vrot.lane.b32.xlu0 %v2364_v14, %s2009_s22 }
 0x1bb   :  { %960 = vrot.lane.b32.xlu2 %v2375_v19, %s2005_s18 }
 0x1bc   :  { %v945_v4 = vpop.permute.xlu1 %944  ;;  %v1003_v52 = vpop.permute.xlu0 %1002 }
 0x1bd   :  { %v2465_v53 = vsel %vm277_vm3, %v945_v4, %v947_v46  ;;  %v2468_v55 = vsel %vm323_vm2, %v1003_v52, %v1005_v48  ;;  %v713_v56 = vpop.permute.xlu2 %712 }
 0x1c0   :  { %844 = vrot.lane.b32.xlu1 %v2375_v19, %s2007_s20  ;;  %1132 = vrot.lane.b32.xlu0 %v2366_v15, %s2002_s0 }
 0x1c3   :  { %902 = vrot.lane.b32.xlu2 %v2375_v19, %s2006_s19 }
 0x1c4   :  { %v831_v57 = vpop.permute.xlu1 %830  ;;  %v889_v58 = vpop.permute.xlu0 %888 }
 0x1c5   :  { %v2477_v54 = vsel %vm235_vm4, %v887_v47, %v889_v58  ;;  %v1065_v59 = vpop.permute.xlu2 %1064 }
 0x1c6   :  { %v2480_v60 = vsel %vm370_vm0, %v1063_v49, %v1065_v59 }
 0x1c8   :  { %904 = vrot.lane.b32.xlu1 %v2394_v28, %s2006_s19  ;;  %1018 = vrot.lane.b32.xlu0 %v2375_v19, %s2004_s17 }
 0x1cb   :  { %1136 = vrot.lane.b32.xlu2 %v2394_v28, %s2002_s0 }
 0x1cc   :  { %v771_v63 = vpop.permute.xlu1 %770  ;;  %v829_v1 = vpop.permute.xlu0 %828 }
 0x1cd   :  { %v2490_v2 = vsel %vm151_vm6, %v771_v63, %v2456_v51  ;;  %v2493_v5 = vsel %vm193_vm5, %v829_v1, %v831_v57  ;;  %v949_v6 = vpop.permute.xlu2 %948 }
 0x1ce   :  { %v2496_v7 = vsel %vm277_vm3, %v947_v46, %v949_v6 }
 0x1d0   :  { %1068 = vrot.lane.b32.xlu1 %v2403_v32, %s2003_s6  ;;  %1078 = vrot.lane.b32.xlu0 %v2394_v28, %s2003_s6 }
 0x1d3   :  { %962 = vrot.lane.b32.xlu2 %v2394_v28, %s2005_s18 }
 0x1d4   :  { %v1121_v8 = vpop.permute.xlu1 %1120  ;;  %v2504_v9 = vpop.permute.xlu0 %714 }
 0x1d5   :  { %v2508_v10 = vsel %vm109_vm7, %v713_v56, %v2504_v9  ;;  %v1123_v12 = vpop.permute.xlu2 %1122 }
 0x1d6   :  { %v2511_v13 = vsel %vm417_vm1, %v1121_v8, %v1123_v12 }
 0x1d8   :  { %952 = vrot.lane.b32.xlu1 %v2403_v32, %s2005_s18  ;;  %1020 = vrot.lane.b32.xlu0 %v2394_v28, %s2004_s17 }
 0x1db   :  { %1010 = vrot.lane.b32.xlu2 %v2403_v32, %s2004_s17 }
 0x1dc   :  { %v1007_v16 = vpop.permute.xlu1 %1006  ;;  %v1119_v17 = vpop.permute.xlu0 %1118 }
 0x1dd   :  { %v2520_v18 = vsel %vm323_vm2, %v1005_v48, %v1007_v16  ;;  %v2523_v20 = vsel %vm417_vm1, %v1119_v17, %v1121_v8  ;;  %v2525_v21 = vpop.permute.xlu2 %832 }
 0x1de   :  { %v2529_v22 = vsel %vm193_vm5, %v831_v57, %v2525_v21 }
 0x1e0   :  { %1080 = vrot.lane.b32.xlu1 %v2413_v36, %s2003_s6  ;;  %786 = vrot.lane.b32.xlu0 %v2375_v19, %s2008_s21 }
 0x1e3   :  { %1070 = vrot.lane.b32.xlu2 %v2424_v3, %s2003_s6 }
 0x1e5   :  { %v1073_v0 = vpop.permute.xlu2 %1072 }
 0x1e8   :  { %1022 = vrot.lane.b32.xlu1 %v2413_v36, %s2004_s17  ;;  %964 = vrot.lane.b32.xlu0 %v2413_v36, %s2005_s18 }
 0x1eb   :  { %906 = vrot.lane.b32.xlu2 %v2413_v36, %s2006_s19 }
 0x1ed   :  { %v2543_v24 = vpop.permute.xlu2 %1016 }
 0x1f0   :  { %1082 = vrot.lane.b32.xlu1 %v2435_v45, %s2003_s6  ;;  %1024 = vrot.lane.b32.xlu0 %v2435_v45, %s2004_s17 }
 0x1f2   :  { %v2549_v25 = vpop.permute.xlu1 %1008  ;;  %v2551_v26 = vpop.permute.xlu0 %1066 }
 0x1f3   :  { %v2555_v27 = vsel %vm323_vm2, %v1007_v16, %v2549_v25  ;;  %v2559_v29 = vsel %vm370_vm0, %v1065_v59, %v2551_v26  ;;  %892 = vrot.lane.b32.xlu2 %v2384_v23, %s2006_s19 }
 0x1f5   :  { %v957_v30 = vpop.permute.xlu2 %956 }
 0x1f8   :  { %774 = vrot.lane.b32.xlu1 %v2361_v11, %s2008_s21  ;;  %894 = vrot.lane.b32.xlu0 %v2403_v32, %s2006_s19 }
 0x1fa   :  { %v1075_v31 = vpop.permute.xlu1 %1074  ;;  %v2567_v33 = vpop.permute.xlu0 %890 }
 0x1fb   :  { %v1089_v34 = vsel %vm370_vm0, %v1073_v0, %v1075_v31  ;;  %v2572_v35 = vsel %vm235_vm4, %v889_v58, %v2567_v33  ;;  %728 = vrot.lane.b32.xlu2 %v2375_v19, %s2009_s22 }
 0x1fc   :  { %1307 = vmatpush.msrb.mxu2 %v1089_v34 }
 0x1fd   :  { %v2576_v37 = vpop.permute.xlu2 %842 }
 0x1fe   :  { %1308 = vmatpush.msrb.mxu2 %v2454_v50 }
 0x200   :  { %1012 = vrot.lane.b32.xlu1 %v2424_v3, %s2004_s17  ;;  %846 = vrot.lane.b32.xlu0 %v2394_v28, %s2007_s20  ;;  %s1837_s17 = sshll.u32 %s2928_s7, 4  ;;  %s1838_s17 = int_to_ptr.hbm [resolvable:$true] %s1837_s17 }
 0x202   :  { %v1015_v38 = vpop.permute.xlu1 %1014  ;;  %v2583_v39 = vpop.permute.xlu0 %1124 }
 0x203   :  { %v1031_v40 = vsel %vm323_vm2, %v1015_v38, %v2543_v24  ;;  %v2589_v19 = vsel %vm417_vm1, %v1123_v12, %v2583_v39  ;;  %966 = vrot.lane.b32.xlu2 %v2435_v45, %s2005_s18 }
 0x204   :  { %1309 = vmatpush.msrb.mxu2 %v1031_v40 }
 0x205   :  { %v783_v41 = vpop.permute.xlu2 %782 }
 0x206   :  { %1310 = vmatpush.msrb.mxu2 %v2468_v55 }
 0x208   :  { %848 = vrot.lane.b32.xlu1 %v2413_v36, %s2007_s20  ;;  %716 = vrot.lane.b32.xlu0 %v2361_v11, %s2009_s22 }
 0x20a   :  { %v901_v42 = vpop.permute.xlu1 %900  ;;  %v2598_v43 = vpop.permute.xlu0 %950 }
 0x20b   :  { %v2602_v44 = vsel %vm277_vm3, %v949_v6, %v2598_v43  ;;  %836 = vrot.lane.b32.xlu2 %v2403_v32, %s2007_s20 }
 0x20d   :  { %v1131_v46 = vpop.permute.xlu2 %1130 }
 0x210   :  { %834 = vrot.lane.b32.xlu1 %v2384_v23, %s2007_s20  ;;  %954 = vrot.lane.b32.xlu0 %v2424_v3, %s2005_s18 }
 0x212   :  { %v841_v47 = vpop.permute.xlu1 %840  ;;  %v959_v48 = vpop.permute.xlu0 %958 }
 0x213   :  { %v857_v11 = vsel %vm193_vm5, %v841_v47, %v2576_v37  ;;  %v973_v49 = vsel %vm277_vm3, %v957_v30, %v959_v48  ;;  %790 = vrot.lane.b32.xlu2 %v2413_v36, %s2008_s21 }
 0x214   :  { %1311 = vmatpush.msrb.mxu2 %v973_v49 }
 0x215   :  { %v961_v50 = vpop.permute.xlu2 %960 }
 0x216   :  { %v2616_v4 = vsel %vm277_vm3, %v959_v48, %v961_v50  ;;  %1312 = vmatpush.msrb.mxu2 %v2465_v53 }
 0x218   :  { %788 = vrot.lane.b32.xlu1 %v2394_v28, %s2008_s21  ;;  %1138 = vrot.lane.b32.xlu0 %v2413_v36, %s2002_s0 }
 0x21a   :  { %v2623_v52 = vpop.permute.xlu1 %726  ;;  %v899_v55 = vpop.permute.xlu0 %898 }
 0x21b   :  { %v915_v56 = vsel %vm235_vm4, %v899_v55, %v901_v42  ;;  %776 = vrot.lane.b32.xlu2 %v2384_v23, %s2008_s21 }
 0x21c   :  { %1313 = vmatpush.msrb.mxu2 %v915_v56 }
 0x21d   :  { %v903_v57 = vpop.permute.xlu2 %902 }
 0x21e   :  { %v2629_v58 = vsel %vm235_vm4, %v901_v42, %v903_v57  ;;  %1314 = vmatpush.msrb.mxu2 %v2477_v54 }
 0x220   :  { %908 = vrot.lane.b32.xlu1 %v2435_v45, %s2006_s19  ;;  %778 = vrot.lane.b32.xlu0 %v2403_v32, %s2008_s21 }
 0x221   :  { %1315 = vmatpush.msrb.mxu2 %v857_v11 }
 0x222   :  { %v2636_v53 = vpop.permute.xlu1 %1076  ;;  %v2638_v59 = vpop.permute.xlu0 %784 }
 0x223   :  { %v1090_v63 = vsel %vm370_vm0, %v1075_v31, %v2636_v53  ;;  %v799_v1 = vsel %vm151_vm6, %v783_v41, %v2638_v59  ;;  %896 = vrot.lane.b32.xlu2 %v2424_v3, %s2006_s19  ;;  %1316 = vmatpush.msrb.mxu2 %v2493_v5  ;;  %v2699_v31 = vld [vmem:[%s2924_s3 + $0x8] sm:$0xff] }
 0x225   :  { %v2647_v54 = vpop.permute.xlu2 %1136  ;;  %1317 = vmatpush.msrb.mxu2 %v799_v1 }
 0x227   :  { %1318 = vmatpush.msrb.mxu2 %v2490_v2 }
 0x228   :  { %1126 = vrot.lane.b32.xlu1 %v2403_v32, %s2002_s0  ;;  %730 = vrot.lane.b32.xlu0 %v2394_v28, %s2009_s22  ;;  %v2675_v28 = vld [vmem:[%s2924_s3] sm:$0xff] }
 0x22a   :  { %v1135_v6 = vpop.permute.xlu1 %1134  ;;  %v725_v8 = vpop.permute.xlu0 %724 }
 0x22b   :  { %v1149_v12 = vsel %vm417_vm1, %v1135_v6, %v2647_v54  ;;  %v741_v16 = vsel %vm109_vm7, %v725_v8, %v2623_v52  ;;  %850 = vrot.lane.b32.xlu2 %v2435_v45, %s2007_s20 }
 0x22c   :  { %1319 = vmatpush.msrb.mxu2 %v741_v16 }
 0x22d   :  { %v2660_v5 = vpop.permute.xlu2 %962 }
 0x22e   :  { %v2664_v2 = vsel %vm277_vm3, %v961_v50, %v2660_v5  ;;  %1320 = vmatpush.msrb.mxu2 %v2508_v10 }
 0x230   :  { %732 = vrot.lane.b32.xlu1 %v2413_v36, %s2009_s22  ;;  %718 = vrot.lane.b32.xlu0 %v2384_v23, %s2009_s22 }
 0x231   :  { %1321 = vmatpush.msrb.mxu2 %v2364_v14 }
 0x232   :  { %v2677_v17 = vpop.permute.xlu1 %844  ;;  %v1133_v0 = vpop.permute.xlu0 %1132 }
 0x233   :  { %v858_v10 = vsel %vm193_vm5, %v2576_v37, %v2677_v17  ;;  %v1147_v30 = vsel %vm417_vm1, %v1131_v46, %v1133_v0  ;;  %v1148_v36 = vsel %vm417_vm1, %v1133_v0, %v1135_v6  ;;  %838 = vrot.lane.b32.xlu2 %v2424_v3, %s2007_s20  ;;  %1322 = vmatpush.msrb.mxu2 %v2321_v61  ;;  %v2712_v61 = vld [vmem:[%s2924_s3 + $0x10] sm:$0xff]  ;;  %v2727_v37 = vld [vmem:[%s2924_s3 + $0x18] sm:$0xff] }
 0x234   :  { %1323 = vmatmul.f32.vlgmr.msrb.gmra.mxu2 %v2675_v28  ;;  %1344 = vmatpush.msrb.mxu3 %v1147_v30 }
 0x235   :  { %v2688_v14 = vpop.permute.xlu2 %1010  ;;  %1436 = vmatpush.msra.mxu2 %v1149_v12  ;;  %1390 = vmatpush.msra.mxu0 %v1148_v36 }
 0x236   :  { %v2693_v23 = vsel %vm323_vm2, %v2549_v25, %v2688_v14  ;;  %1345 = vmatpush.msrb.mxu3 %v2523_v20 }
 0x237   :  { %1437 = vmatpush.msra.mxu2 %v2589_v19  ;;  %1391 = vmatpush.msra.mxu0 %v2511_v13 }
 0x238   :  { %720 = vrot.lane.b32.xlu1 %v2403_v32, %s2009_s22  ;;  %792 = vrot.lane.b32.xlu0 %v2435_v45, %s2008_s21 }
 0x239   :  { %1863 = vmatmul.msk.f32.vlgmr.msrb.gmra.mxu3 %vm1300_vm11, %v2699_v31  ;;  %1865 = vmatmul.msk.f32.vlgmr.msra.gmra.mxu0 %vm1300_vm11, %v2699_v31 }
 0x23a   :  { %v905_v20 = vpop.permute.xlu1 %904  ;;  %v1019_v25 = vpop.permute.xlu0 %1018  ;;  %1353 = vmatpush.msra.mxu3 %v1090_v63 }
 0x23b   :  { %v917_v13 = vsel %vm235_vm4, %v903_v57, %v905_v20  ;;  %v1032_v32 = vsel %vm323_vm2, %v2543_v24, %v1019_v25  ;;  %734 = vrot.lane.b32.xlu2 %v2435_v45, %s2009_s22 }
 0x23c   :  { %1354 = vmatpush.msra.mxu3 %v2480_v60  ;;  %1326 = vmatmul.f32.gmra.mxu2 %v2712_v61 }
 0x23d   :  { %v1071_v34 = vpop.permute.xlu2 %1070 }
 0x23e   :  { %1111 = vst.msk [vmem:[#allocation3 + $0x2c8] sm:$0xff] %vm692_vm10, %v1071_v34  ;;  %1355 = vmatpush.msra.mxu3 %v1032_v32 }
 0x240   :  { %780 = vrot.lane.b32.xlu1 %v2424_v3, %s2008_s21  ;;  %722 = vrot.lane.b32.xlu0 %v2424_v3, %s2009_s22 }
 0x241   :  { %1356 = vmatpush.msra.mxu3 %v2520_v18  ;;  %1866 = vmatmul.msk.f32.gmra.mxu0 %vm1300_vm11, %v2727_v37 }
 0x242   :  { %v1069_v60 = vpop.permute.xlu1 %1068  ;;  %v1079_v24 = vpop.permute.xlu0 %1078  ;;  %1864 = vmatmul.msk.f32.gmra.mxu3 %vm1300_vm11, %v2727_v37 }
 0x243   :  { %v1087_v38 = vsel %vm370_vm0, %v2551_v26, %v1069_v60  ;;  %v2741_v40 = vsel %vm370_vm0, %v1069_v60, %v1071_v34  ;;  %v1091_v19 = vsel %vm370_vm0, %v2636_v53, %v1079_v24  ;;  %1128 = vrot.lane.b32.xlu2 %v2424_v3, %s2002_s0  ;;  %1357 = vmatpush.msra.mxu3 %v2616_v4  ;;  %v1288_v26 = vld [vmem:[%s2925_s4] sm:$0xff] }
 0x244   :  { %1399 = vmatpush.msra.mxu1 %v1091_v19  ;;  %1867 = vmatmul.msk.f32.vlgmr.msra.gmra.mxu2 %vm1300_vm11, %v2699_v31 }
 0x245   :  { %v2750_v18 = vpop.permute.xlu2 %906  ;;  %1358 = vmatpush.msra.mxu3 %v2496_v7 }
 0x246   :  { %v918_v41 = vsel %vm235_vm4, %v905_v20, %v2750_v18  ;;  %1400 = vmatpush.msra.mxu1 %v2559_v29 }
 0x247   :  { %1359 = vmatpush.msra.mxu3 %v2629_v58 }
 0x248   :  { %1140 = vrot.lane.b32.xlu1 %v2435_v45, %s2002_s0  ;;  %1292 = vperm.xlu0 %1893, %v1288_v26   ;;  %v1289_v45 = vld [vmem:[%s2925_s4 + $0x8] sm:$0xff]  ;;  %s2011_s4 = smov [#allocation10]  }
 0x249   :  { %1360 = vmatpush.msra.mxu3 %v2572_v35  ;;  %s1835_s16 = sshll.u32 %s2011_s4, 4  ;;  %s1836_s16 = int_to_ptr.vmem [resolvable:$true] %s1835_s16 }
 0x24a   :  { %v2763_v3 = vpop.permute.xlu1 %952  ;;  %v1021_v42 = vpop.permute.xlu0 %1020 }
 0x24b   :  { %v971_v7 = vsel %vm277_vm3, %v2598_v43, %v2763_v3  ;;  %v1033_v46 = vsel %vm323_vm2, %v1019_v25, %v1021_v42  ;;  %1361 = vmatpush.msra.mxu3 %v858_v10 }
 0x24c   :  { %1401 = vmatpush.msra.mxu1 %v1033_v46  ;;  %1868 = vmatmul.msk.f32.gmra.mxu2 %vm1300_vm11, %v2727_v37 }
 0x24d   :  { %v893_v29 = vpop.permute.xlu2 %892  ;;  %1362 = vmatpush.msra.mxu3 %v2529_v22 }
 0x24e   :  { %v912_v35 = vsel %vm235_vm4, %v2567_v33, %v893_v29  ;;  %1402 = vmatpush.msra.mxu1 %v2555_v27 }
 0x250   :  { %1297 = vperm.xlu1 %1894, %v1289_v45   ;;  %1403 = vmatpush.msra.mxu1 %v2664_v2 }
 0x252   :  { %v1081_v43 = vpop.permute.xlu1 %1080  ;;  %v2779_v47 = vpop.permute.xlu0 %786  ;;  %1404 = vmatpush.msra.mxu1 %v2602_v44 }
 0x253   :  { %v1092_v48 = vsel %vm370_vm0, %v1079_v24, %v1081_v43  ;;  %v800_v11 = vsel %vm151_vm6, %v2638_v59, %v2779_v47 }
 0x254   :  { %1363 = vmatpush.msra.mxu3 %v800_v11  ;;  %1405 = vmatpush.msra.mxu1 %v917_v13 }
 0x255   :  { %v2786_v22 = vpop.permute.xlu2 %728  ;;  %1445 = vmatpush.msrb.mxu0 %v1092_v48 }
 0x256   :  { %v742_v27 = vsel %vm109_vm7, %v2623_v52, %v2786_v22  ;;  %1406 = vmatpush.msra.mxu1 %v912_v35 }
 0x257   :  { %1446 = vmatpush.msrb.mxu0 %v1087_v38 }
 0x25a   :  { %v1023_v33 = vpop.permute.xlu1 %1022  ;;  %v965_v49 = vpop.permute.xlu0 %964 }
 0x25b   :  { %v1034_v44 = vsel %vm323_vm2, %v1021_v42, %v1023_v33  ;;  %v976_v50 = vsel %vm277_vm3, %v2660_v5, %v965_v49 }
 0x25c   :  { %1447 = vmatpush.msrb.mxu0 %v1034_v44 }
 0x25d   :  { %v967_v4 = vpop.permute.xlu2 %966 }
 0x25e   :  { %v977_v55 = vsel %vm277_vm3, %v965_v49, %v967_v4  ;;  %1001 = vst.msk [vmem:[#allocation3 + $0x238] sm:$0xff] %vm692_vm10, %v967_v4  ;;  %1448 = vmatpush.msrb.mxu0 %v2693_v23 }
 0x260   :  { %1449 = vmatpush.msrb.mxu0 %v976_v50  ;;  %v1188_v50 = vld [vmem:[#allocation3 + $0x40] sm:$0xff] }
 0x262   :  { %v1083_v56 = vpop.permute.xlu1 %1082  ;;  %v1025_v52 = vpop.permute.xlu0 %1024  ;;  %1450 = vmatpush.msrb.mxu0 %v971_v7 }
 0x263   :  { %v1093_v57 = vsel %vm370_vm0, %v1081_v43, %v1083_v56  ;;  %1117 = vst.msk [vmem:[#allocation3 + $0x2f8] sm:$0xff] %vm692_vm10, %v1083_v56  ;;  %v1035_v58 = vsel %vm323_vm2, %v1023_v33, %v1025_v52 }
 0x264   :  { %1451 = vmatpush.msrb.mxu0 %v918_v41  ;;  %1059 = vst.msk [vmem:[#allocation3 + $0x298] sm:$0xff] %vm692_vm10, %v1025_v52 }
 0x265   :  { %v837_v53 = vpop.permute.xlu2 %836  ;;  %v1251_v44 = vld [vmem:[#allocation3 + $0x238] sm:$0xff] }
 0x26a   :  { %v775_v59 = vpop.permute.xlu1 %774  ;;  %v895_v63 = vpop.permute.xlu0 %894  ;;  %v1275_v45 = vld [vmem:[#allocation3 + $0x2f8] sm:$0xff] }
 0x26b   :  { %v795_v1 = vsel %vm151_vm6, %v2456_v51, %v775_v59  ;;  %v913_v6 = vsel %vm235_vm4, %v893_v29, %v895_v63  ;;  %v1263_v48 = vld [vmem:[#allocation3 + $0x298] sm:$0xff] }
 0x26c   :  { %1364 = vmatpush.msra.mxu3 %v795_v1  ;;  %1452 = vmatpush.msrb.mxu0 %v913_v6  ;;  %v1189_v1 = vld [vmem:[#allocation3 + $0x48] sm:$0xff] }
 0x26d   :  { %v2804_v8 = vpop.permute.xlu2 %790 }
 0x26e   :  { %1365 = vmatpush.msra.mxu3 %v742_v27 }
 0x272   :  { %v1013_v12 = vpop.permute.xlu1 %1012  ;;  %v847_v16 = vpop.permute.xlu0 %846 }
 0x273   :  { %v1030_v5 = vsel %vm323_vm2, %v2688_v14, %v1013_v12  ;;  %1053 = vst.msk [vmem:[#allocation3 + $0x268] sm:$0xff] %vm692_vm10, %v1013_v12  ;;  %v859_v2 = vsel %vm193_vm5, %v2677_v17, %v847_v16  ;;  %v1183_v12 = vld [vmem:[#allocation3 + $0x18] sm:$0xff] }
 0x274   :  { %1407 = vmatpush.msra.mxu1 %v859_v2 }
 0x275   :  { %v777_v0 = vpop.permute.xlu2 %776 }
 0x276   :  { %v796_v51 = vsel %vm151_vm6, %v775_v59, %v777_v0 }
 0x27a   :  { %v849_v10 = vpop.permute.xlu1 %848  ;;  %v2812_v30 = vpop.permute.xlu0 %716 }
 0x27b   :  { %v860_v36 = vsel %vm193_vm5, %v847_v16, %v849_v10  ;;  %v737_v23 = vsel %vm109_vm7, %v2504_v9, %v2812_v30 }
 0x27c   :  { %1366 = vmatpush.msra.mxu3 %v737_v23  ;;  %1453 = vmatpush.msrb.mxu0 %v860_v36  ;;  %v1184_v23 = vld [vmem:[#allocation3 + $0x20] sm:$0xff] }
 0x27d   :  { %v897_v14 = vpop.permute.xlu2 %896 }
 0x27e   :  { %v914_v20 = vsel %vm235_vm4, %v895_v63, %v897_v14  ;;  %937 = vst.msk [vmem:[#allocation3 + $0x1a8] sm:$0xff] %vm692_vm10, %v897_v14  ;;  %1367 = vmatpush.msra.mxu3 %v2366_v15 }
 0x280   :  { %1368 = vmatpush.msra.mxu3 %v2323_v62 }
 0x281   :  { %1369 = vmatmul.f32.vlgmr.msra.gmra.mxu3 %v2675_v28 }
 0x282   :  { %v835_v17 = vpop.permute.xlu1 %834  ;;  %v955_v25 = vpop.permute.xlu0 %954  ;;  %1491 = vmatpush.msrb.mxu3 %v1093_v57 }
 0x283   :  { %v854_v13 = vsel %vm193_vm5, %v2525_v21, %v835_v17  ;;  %v855_v9 = vsel %vm193_vm5, %v835_v17, %v837_v53  ;;  %v972_v32 = vsel %vm277_vm3, %v2763_v3, %v955_v25  ;;  %995 = vst.msk [vmem:[#allocation3 + $0x208] sm:$0xff] %vm692_vm10, %v955_v25  ;;  %v1609_v25 = vld [vmem:[#allocation9 + $0x70] sm:$0xff] }
 0x284   :  { %1492 = vmatpush.msrb.mxu3 %v2741_v40  ;;  %1408 = vmatpush.msra.mxu1 %v854_v13  ;;  %v1191_v13 = vld [vmem:[#allocation3 + $0x58] sm:$0xff] }
 0x285   :  { %v851_v15 = vpop.permute.xlu2 %850  ;;  %1454 = vmatpush.msrb.mxu0 %v855_v9  ;;  %v1608_v9 = vld [vmem:[#allocation9 + $0x68] sm:$0xff] }
 0x286   :  { %v861_v62 = vsel %vm193_vm5, %v849_v10, %v851_v15  ;;  %1493 = vmatpush.msrb.mxu3 %v1035_v58  ;;  %885 = vst.msk [vmem:[#allocation3 + $0x178] sm:$0xff] %vm692_vm10, %v851_v15  ;;  %v1233_v58 = vld [vmem:[#allocation3 + $0x1a8] sm:$0xff] }
 0x288   :  { %1494 = vmatpush.msrb.mxu3 %v1030_v5 }
 0x289   :  { %1372 = vmatmul.f32.gmra.mxu3 %v2712_v61 }
 0x28a   :  { %v789_v21 = vpop.permute.xlu1 %788  ;;  %v2833_v34 = vpop.permute.xlu0 %1138  ;;  %1495 = vmatpush.msrb.mxu3 %v977_v55  ;;  %v1245_v4 = vld [vmem:[#allocation3 + $0x208] sm:$0xff]  ;;  %v1182_v55 = vld [vmem:[#allocation3 + $0x10] sm:$0xff] }
 0x28b   :  { %v801_v60 = vsel %vm151_vm6, %v2779_v47, %v789_v21  ;;  %v802_v24 = vsel %vm151_vm6, %v789_v21, %v2804_v8  ;;  %v1150_v38 = vsel %vm417_vm1, %v2647_v54, %v2833_v34  ;;  %v1269_v47 = vld [vmem:[#allocation3 + $0x2c8] sm:$0xff] }
 0x28c   :  { %1496 = vmatpush.msrb.mxu3 %v972_v32  ;;  %1409 = vmatpush.msra.mxu1 %v801_v60  ;;  %v1185_v32 = vld [vmem:[#allocation3 + $0x28] sm:$0xff]  ;;  %v1605_v60 = vld [vmem:[#allocation9 + $0x50] sm:$0xff] }
 0x28d   :  { %v839_v40 = vpop.permute.xlu2 %838  ;;  %1455 = vmatpush.msrb.mxu0 %v802_v24  ;;  %1482 = vmatpush.msrb.mxu2 %v1150_v38  ;;  %v1227_v63 = vld [vmem:[#allocation3 + $0x178] sm:$0xff]  ;;  %v1626_v24 = vld [vmem:[#allocation9 + $0xf8] sm:$0xff] }
 0x28e   :  { %v856_v19 = vsel %vm193_vm5, %v837_v53, %v839_v40  ;;  %1410 = vmatpush.msra.mxu1 %v796_v51  ;;  %879 = vst.msk [vmem:[#allocation3 + $0x148] sm:$0xff] %vm692_vm10, %v839_v40  ;;  %v1190_v51 = vld [vmem:[#allocation3 + $0x50] sm:$0xff]  ;;  %v1625_v38 = vld [vmem:[#allocation9 + $0xf0] sm:$0xff] }
 0x28f   :  { %v1604_v40 = vld [vmem:[#allocation9 + $0x48] sm:$0xff] }
 0x292   :  { %v909_v26 = vpop.permute.xlu1 %908  ;;  %v2844_v41 = vpop.permute.xlu0 %778 }
 0x293   :  { %v919_v3 = vsel %vm235_vm4, %v2750_v18, %v909_v26  ;;  %943 = vst.msk [vmem:[#allocation3 + $0x1d8] sm:$0xff] %vm692_vm10, %v909_v26  ;;  %v797_v54 = vsel %vm151_vm6, %v777_v0, %v2844_v41  ;;  %v1623_v26 = vld [vmem:[#allocation9 + $0xe0] sm:$0xff] }
 0x294   :  { %1456 = vmatpush.msrb.mxu0 %v797_v54  ;;  %1497 = vmatpush.msrb.mxu3 %v919_v3  ;;  %v1601_v3 = vld [vmem:[#allocation9 + $0x30] sm:$0xff] }
 0x295   :  { %v735_v42 = vpop.permute.xlu2 %734  ;;  %v1221_v6 = vld [vmem:[#allocation3 + $0x148] sm:$0xff] }
 0x296   :  { %769 = vst.msk [vmem:[#allocation3 + $0xb8] sm:$0xff] %vm692_vm10, %v735_v42  ;;  %1498 = vmatpush.msrb.mxu3 %v914_v20  ;;  %v1610_v20 = vld [vmem:[#allocation9 + $0x78] sm:$0xff] }
 0x298   :  { %1499 = vmatpush.msrb.mxu3 %v861_v62  ;;  %v1607_v62 = vld [vmem:[#allocation9 + $0x60] sm:$0xff] }
 0x29a   :  { %v1127_v7 = vpop.permute.xlu1 %1126  ;;  %v731_v46 = vpop.permute.xlu0 %730  ;;  %1500 = vmatpush.msrb.mxu3 %v856_v19  ;;  %v1239_v56 = vld [vmem:[#allocation3 + $0x1d8] sm:$0xff]  ;;  %v1603_v19 = vld [vmem:[#allocation9 + $0x40] sm:$0xff] }
 0x29b   :  { %v1145_v29 = vsel %vm417_vm1, %v2583_v39, %v1127_v7  ;;  %v743_v18 = vsel %vm109_vm7, %v2786_v22, %v731_v46  ;;  %v1257_v22 = vld [vmem:[#allocation3 + $0x268] sm:$0xff] }
 0x29c   :  { %1411 = vmatpush.msra.mxu1 %v743_v18  ;;  %1483 = vmatpush.msrb.mxu2 %v1145_v29  ;;  %v1599_v29 = vld [vmem:[#allocation9 + $0x20] sm:$0xff] }
 0x29d   :  { %v1129_v35 = vpop.permute.xlu2 %1128  ;;  %1869 = vmatmul.msk.f32.vlgmr.msrb.gmra.mxu2 %vm1300_vm11, %v2699_v31  ;;  %v1203_v14 = vld [vmem:[#allocation3 + $0xb8] sm:$0xff] }
 0x29e   :  { %1537 = vmatpush.msra.mxu2 %v1275_v45  ;;  %v2857_v43 = vsel %vm417_vm1, %v1127_v7, %v1129_v35  ;;  %1169 = vst.msk [vmem:[#allocation3 + $0x328] sm:$0xff] %vm692_vm10, %v1129_v35  ;;  %v1600_v7 = vld [vmem:[#allocation9 + $0x28] sm:$0xff]  ;;  %v1619_v45 = vld [vmem:[#allocation9 + $0xc0] sm:$0xff]  ;;  %v1598_v35 = vld [vmem:[#allocation9 + $0x18] sm:$0xff] }
 0x2a0   :  { %1538 = vmatpush.msra.mxu2 %v1269_v47  ;;  %v1597_v47 = vld [vmem:[#allocation9 + $0x10] sm:$0xff] }
 0x2a2   :  { %1539 = vmatpush.msra.mxu2 %v1263_v48  ;;  %v733_v39 = vpop.permute.xlu1 %732  ;;  %v719_v11 = vpop.permute.xlu0 %718  ;;  %v1617_v48 = vld [vmem:[#allocation9 + $0xb0] sm:$0xff] }
 0x2a3   :  { %v744_v27 = vsel %vm109_vm7, %v731_v46, %v733_v39  ;;  %v745_v33 = vsel %vm109_vm7, %v733_v39, %v735_v42  ;;  %v738_v49 = vsel %vm109_vm7, %v2812_v30, %v719_v11  ;;  %v1621_v42 = vld [vmem:[#allocation9 + $0xd0] sm:$0xff] }
 0x2a4   :  { %1540 = vmatpush.msra.mxu2 %v1257_v22  ;;  %1412 = vmatpush.msra.mxu1 %v738_v49  ;;  %v1595_v49 = vld [vmem:[#allocation9] sm:$0xff] }
 0x2a5   :  { %1457 = vmatpush.msrb.mxu0 %v744_v27  ;;  %1870 = vmatmul.msk.f32.gmra.mxu2 %vm1300_vm11, %v2727_v37  ;;  %v1281_v21 = vld [vmem:[#allocation3 + $0x328] sm:$0xff] }
 0x2a6   :  { %1541 = vmatpush.msra.mxu2 %v1251_v44  ;;  %1413 = vmatpush.msra.mxu1 %v1188_v50  ;;  %v1615_v44 = vld [vmem:[#allocation9 + $0xa0] sm:$0xff] }
 0x2a8   :  { %1542 = vmatpush.msra.mxu2 %v1245_v4  ;;  %1414 = vmatpush.msra.mxu1 %v1182_v55 }
 0x2a9   :  { %1415 = vmatmul.f32.vlgmr.msra.gmra.mxu1 %v2675_v28 }
 0x2aa   :  { %1543 = vmatpush.msra.mxu2 %v1239_v56  ;;  %v721_v52 = vpop.permute.xlu1 %720  ;;  %v793_v57 = vpop.permute.xlu0 %792 }
 0x2ab   :  { %v739_v53 = vsel %vm109_vm7, %v719_v11, %v721_v52  ;;  %v803_v59 = vsel %vm151_vm6, %v2804_v8, %v793_v57  ;;  %827 = vst.msk [vmem:[#allocation3 + $0x118] sm:$0xff] %vm692_vm10, %v793_v57  ;;  %v1596_v11 = vld [vmem:[#allocation9 + $0x8] sm:$0xff]  ;;  %v1614_v57 = vld [vmem:[#allocation9 + $0x98] sm:$0xff] }
 0x2ac   :  { %1544 = vmatpush.msra.mxu2 %v1233_v58  ;;  %1458 = vmatpush.msrb.mxu0 %v739_v53  ;;  %v1613_v58 = vld [vmem:[#allocation9 + $0x90] sm:$0xff]  ;;  %v1612_v53 = vld [vmem:[#allocation9 + $0x88] sm:$0xff] }
 0x2ad   :  { %1501 = vmatpush.msrb.mxu3 %v803_v59  ;;  %v1611_v59 = vld [vmem:[#allocation9 + $0x80] sm:$0xff] }
 0x2ae   :  { %1545 = vmatpush.msra.mxu2 %v1227_v63  ;;  %1459 = vmatpush.msrb.mxu0 %v1189_v1  ;;  %v1642_v63 = vld [vmem:[#allocation9 + $0x178] sm:$0xff]  ;;  %v1641_v1 = vld [vmem:[#allocation9 + $0x170] sm:$0xff] }
 0x2b0   :  { %1546 = vmatpush.msra.mxu2 %v1221_v6  ;;  %1460 = vmatpush.msrb.mxu0 %v1183_v12  ;;  %v1640_v6 = vld [vmem:[#allocation9 + $0x168] sm:$0xff]  ;;  %v1658_v12 = vld [vmem:[#allocation9 + $0x1f8] sm:$0xff] }
 0x2b1   :  { %1418 = vmatmul.f32.gmra.mxu1 %v2712_v61  ;;  %1461 = vmatmul.f32.vlgmr.msrb.gmra.mxu0 %v2675_v28 }
 0x2b2   :  { %v781_v16 = vpop.permute.xlu1 %780  ;;  %v723_v5 = vpop.permute.xlu0 %722  ;;  %v1215_v8 = vld [vmem:[#allocation3 + $0x118] sm:$0xff] }
 0x2b3   :  { %v798_v2 = vsel %vm151_vm6, %v2844_v41, %v781_v16  ;;  %821 = vst.msk [vmem:[#allocation3 + $0xe8] sm:$0xff] %vm692_vm10, %v781_v16  ;;  %v740_v0 = vsel %vm109_vm7, %v721_v52, %v723_v5  ;;  %1547 = vmatpush.msra.mxu2 %v1215_v8  ;;  %v1602_v41 = vld [vmem:[#allocation9 + $0x38] sm:$0xff]  ;;  %v1639_v16 = vld [vmem:[#allocation9 + $0x160] sm:$0xff]  ;;  %v1656_v8 = vld [vmem:[#allocation9 + $0x1e8] sm:$0xff] }
 0x2b4   :  { %1502 = vmatpush.msrb.mxu3 %v798_v2  ;;  %763 = vst.msk [vmem:[#allocation3 + $0x88] sm:$0xff] %vm692_vm10, %v723_v5  ;;  %v1657_v5 = vld [vmem:[#allocation9 + $0x1f0] sm:$0xff]  ;;  %v1638_v2 = vld [vmem:[#allocation9 + $0x158] sm:$0xff] }
 0x2b6   :  { %1503 = vmatpush.msrb.mxu3 %v745_v33  ;;  %v1616_v33 = vld [vmem:[#allocation9 + $0xa8] sm:$0xff] }
 0x2b7   :  { %v1324_v54 = vpop.f32.mrf.mxu2 }
 0x2b8   :  { %1504 = vmatpush.msrb.mxu3 %v740_v0  ;;  %v1655_v0 = vld [vmem:[#allocation9 + $0x1e0] sm:$0xff] }
 0x2b9   :  { %1464 = vmatmul.f32.gmra.mxu0 %v2712_v61 }
 0x2ba   :  { %v1141_v10 = vpop.permute.xlu1 %1140  ;;  %v1209_v30 = vld [vmem:[#allocation3 + $0xe8] sm:$0xff]  ;;  %1505 = vmatpush.msrb.mxu3 %v1190_v51  ;;  %v2897_v46 = vpop.permute.xlu0 %1292  ;;  %v1637_v51 = vld [vmem:[#allocation9 + $0x150] sm:$0xff] }
 0x2bb   :  { %v1151_v36 = vsel %vm417_vm1, %v2833_v34, %v1141_v10  ;;  %1175 = vst.msk [vmem:[#allocation3 + $0x358] sm:$0xff] %vm692_vm10, %v1141_v10  ;;  %1548 = vmatpush.msra.mxu2 %v1209_v30  ;;  %v1197_v17 = vld [vmem:[#allocation3 + $0x88] sm:$0xff]  ;;  %v1606_v34 = vld [vmem:[#allocation9 + $0x58] sm:$0xff]  ;;  %v1636_v30 = vld [vmem:[#allocation9 + $0x148] sm:$0xff] }
 0x2bc   :  { %1506 = vmatpush.msrb.mxu3 %v1184_v23  ;;  %1528 = vmatpush.msrb.mxu1 %v1151_v36  ;;  %v1347_v18 = vpop.f32.mrf.mxu3  ;;  %v1654_v10 = vld [vmem:[#allocation9 + $0x1d8] sm:$0xff]  ;;  %v1653_v36 = vld [vmem:[#allocation9 + $0x1d0] sm:$0xff]  ;;  %v1635_v23 = vld [vmem:[#allocation9 + $0x140] sm:$0xff] }
 0x2bd   :  { %1549 = vmatpush.msra.mxu2 %v1203_v14  ;;  %1507 = vmatmul.f32.vlgmr.msrb.gmra.mxu3 %v2675_v28  ;;  %v1652_v14 = vld [vmem:[#allocation9 + $0x1c8] sm:$0xff] }
 0x2be   :  { %1529 = vmatpush.msrb.mxu1 %v2857_v43  ;;  %1714 = vmatpush.msra.mxu3 %v1626_v24  ;;  %v1618_v43 = vld [vmem:[#allocation9 + $0xb8] sm:$0xff] }
 0x2bf   :  { %1550 = vmatpush.msra.mxu2 %v1197_v17  ;;  %1871 = vmatmul.msk.f32.vlgmr.msrb.gmra.mxu1 %vm1300_vm11, %v2699_v31  ;;  %v1327_v27 = vpop.f32.mrf.mxu2  ;;  %v1651_v17 = vld [vmem:[#allocation9 + $0x1c0] sm:$0xff] }
 0x2c0   :  { %1691 = vmatpush.msra.mxu1 %v1610_v20  ;;  %1715 = vmatpush.msra.mxu3 %v1625_v38  ;;  %v1634_v20 = vld [vmem:[#allocation9 + $0x138] sm:$0xff]  ;;  %v1629_v38 = vld [vmem:[#allocation9 + $0x110] sm:$0xff] }
 0x2c1   :  { %1551 = vmatpush.msra.mxu2 %v1191_v13  ;;  %v1393_v13 = vpop.f32.mrf.mxu0 }
 0x2c2   :  { %1692 = vmatpush.msra.mxu1 %v1609_v25  ;;  %v1287_v15 = vld [vmem:[#allocation3 + $0x358] sm:$0xff]  ;;  %v2900_v22 = vpop.permute.xlu1 %1297 }
 0x2c3   :  { %1552 = vmatpush.msra.mxu2 %v1185_v32  ;;  %1574 = vmatpush.msra.mxu0 %v1287_v15  ;;  %v1328_v4 = vadd.f32 %v1327_v27, %v2900_v22  ;;  %v1633_v25 = vld [vmem:[#allocation9 + $0x130] sm:$0xff]  ;;  %v1631_v15 = vld [vmem:[#allocation9 + $0x120] sm:$0xff] }
 0x2c4   :  { %1553 = vmatmul.f32.vlgmr.msra.gmra.mxu2 %v2675_v28  ;;  %1693 = vmatpush.msra.mxu1 %v1608_v9  ;;  %v1624_v28 = vld [vmem:[#allocation9 + $0xe8] sm:$0xff]  ;;  %v1667_v27 = vld [vmem:[#allocation9 + $0x240] sm:$0xff] }
 0x2c5   :  { %1575 = vmatpush.msra.mxu0 %v1281_v21  ;;  %1510 = vmatmul.f32.gmra.mxu3 %v2712_v61  ;;  %v1350_v55 = vpop.f32.mrf.mxu3  ;;  %v1632_v9 = vld [vmem:[#allocation9 + $0x128] sm:$0xff] }
 0x2c6   :  { %1873 = vmatmul.msk.f32.vlgmr.msra.gmra.mxu0 %vm1300_vm11, %v2699_v31  ;;  %1694 = vmatpush.msra.mxu1 %v1607_v62  ;;  %v1622_v31 = vld [vmem:[#allocation9 + $0xd8] sm:$0xff]  ;;  %v1351_v56 = vadd.f32 %v1350_v55, %v1328_v4  ;;  %v1664_v4 = vld [vmem:[#allocation9 + $0x228] sm:$0xff]  ;;  %v1679_v55 = vld [vmem:[#allocation9 + $0x2a0] sm:$0xff] }
 0x2c7   :  { %1872 = vmatmul.msk.f32.gmra.mxu1 %vm1300_vm11, %v2727_v37  ;;  %1716 = vmatpush.msra.mxu3 %v1624_v28  ;;  %v1674_v28 = vld [vmem:[#allocation9 + $0x278] sm:$0xff] }
 0x2c8   :  { %1695 = vmatpush.msra.mxu1 %v1606_v34  ;;  %v1589_v52 = vmax.f32 %v1351_v56, 0.0  ;;  %1737 = vmatpush.msrb.mxu0 %v1642_v63  ;;  %v1630_v34 = vld [vmem:[#allocation9 + $0x118] sm:$0xff]  ;;  %v1663_v56 = vld [vmem:[#allocation9 + $0x220] sm:$0xff] }
 0x2c9   :  { %1717 = vmatpush.msra.mxu3 %v1623_v26  ;;  %1760 = vmatpush.msrb.mxu2 %v1658_v12  ;;  %v1648_v26 = vld [vmem:[#allocation9 + $0x1a8] sm:$0xff] }
 0x2ca   :  { %1696 = vmatpush.msra.mxu1 %v1605_v60  ;;  %1738 = vmatpush.msrb.mxu0 %v1641_v1  ;;  %v1650_v60 = vld [vmem:[#allocation9 + $0x1b8] sm:$0xff] }
 0x2cb   :  { %1718 = vmatpush.msra.mxu3 %v1622_v31  ;;  %1761 = vmatpush.msrb.mxu2 %v1657_v5  ;;  %v1678_v1 = vld [vmem:[#allocation9 + $0x298] sm:$0xff]  ;;  %v1677_v5 = vld [vmem:[#allocation9 + $0x290] sm:$0xff] }
 0x2cc   :  { %1556 = vmatmul.f32.gmra.mxu2 %v2712_v61  ;;  %1697 = vmatpush.msra.mxu1 %v1604_v40  ;;  %v1620_v61 = vld [vmem:[#allocation9 + $0xc8] sm:$0xff]  ;;  %v1649_v40 = vld [vmem:[#allocation9 + $0x1b0] sm:$0xff] }
 0x2cd   :  { %1719 = vmatpush.msra.mxu3 %v1621_v42  ;;  %1739 = vmatpush.msrb.mxu0 %v1640_v6  ;;  %v1659_v6 = vld [vmem:[#allocation9 + $0x200] sm:$0xff] }
 0x2ce   :  { %1874 = vmatmul.msk.f32.gmra.mxu0 %vm1300_vm11, %v2727_v37  ;;  %1698 = vmatpush.msra.mxu1 %v1603_v19  ;;  %v1325_v37 = vadd.f32 %v1324_v54, %v2897_v46  ;;  %v1628_v19 = vld [vmem:[#allocation9 + $0x108] sm:$0xff]  ;;  %v1627_v54 = vld [vmem:[#allocation9 + $0x100] sm:$0xff] }
 0x2cf   :  { %1720 = vmatpush.msra.mxu3 %v1620_v61  ;;  %1740 = vmatpush.msrb.mxu0 %v1639_v16  ;;  %v1672_v61 = vld [vmem:[#allocation9 + $0x268] sm:$0xff] }
 0x2d0   :  { %1699 = vmatpush.msra.mxu1 %v1602_v41  ;;  %v1348_v39 = vadd.f32 %v1347_v18, %v1325_v37  ;;  %1762 = vmatpush.msrb.mxu2 %v1656_v8  ;;  %v1673_v41 = vld [vmem:[#allocation9 + $0x270] sm:$0xff]  ;;  %v1646_v18 = vld [vmem:[#allocation9 + $0x198] sm:$0xff] }
 0x2d1   :  { %1721 = vmatpush.msra.mxu3 %v1619_v45  ;;  %1741 = vmatpush.msrb.mxu0 %v1638_v2  ;;  %v1671_v45 = vld [vmem:[#allocation9 + $0x260] sm:$0xff]  ;;  %v1676_v2 = vld [vmem:[#allocation9 + $0x288] sm:$0xff] }
 0x2d2   :  { %1700 = vmatpush.msra.mxu1 %v1601_v3  ;;  %v1583_v50 = vmax.f32 %v1348_v39, 0.0  ;;  %1763 = vmatpush.msrb.mxu2 %v1655_v0  ;;  %v1396_v3 = vpop.f32.mrf.mxu0  ;;  %v1643_v39 = vld [vmem:[#allocation9 + $0x180] sm:$0xff] }
 0x2d3   :  { %1722 = vmatpush.msra.mxu3 %v1618_v43  ;;  %1742 = vmatpush.msrb.mxu0 %v1637_v51  ;;  %v1670_v43 = vld [vmem:[#allocation9 + $0x258] sm:$0xff]  ;;  %v1675_v0 = vld [vmem:[#allocation9 + $0x280] sm:$0xff] }
 0x2d4   :  { %1701 = vmatpush.msra.mxu1 %v1600_v7  ;;  %1764 = vmatpush.msrb.mxu2 %v1654_v10  ;;  %v1647_v7 = vld [vmem:[#allocation9 + $0x1a0] sm:$0xff] }
 0x2d5   :  { %1723 = vmatpush.msra.mxu3 %v1617_v48  ;;  %1743 = vmatpush.msrb.mxu0 %v1636_v30  ;;  %v1669_v48 = vld [vmem:[#allocation9 + $0x250] sm:$0xff] }
 0x2d6   :  { %1702 = vmatpush.msra.mxu1 %v1599_v29  ;;  %1765 = vmatpush.msrb.mxu2 %v1653_v36 }
 0x2d7   :  { %1724 = vmatpush.msra.mxu3 %v1616_v33  ;;  %1744 = vmatpush.msrb.mxu0 %v1635_v23  ;;  %v1439_v33 = vpop.f32.mrf.mxu2 }
 0x2d8   :  { %1703 = vmatpush.msra.mxu1 %v1598_v35  ;;  %1766 = vmatpush.msrb.mxu2 %v1652_v14  ;;  %v1645_v35 = vld [vmem:[#allocation9 + $0x190] sm:$0xff] }
 0x2d9   :  { %1725 = vmatpush.msra.mxu3 %v1615_v44  ;;  %1745 = vmatpush.msrb.mxu0 %v1634_v20  ;;  %v1665_v44 = vld [vmem:[#allocation9 + $0x230] sm:$0xff] }
 0x2da   :  { %1704 = vmatpush.msra.mxu1 %v1597_v47  ;;  %1767 = vmatpush.msrb.mxu2 %v1651_v17  ;;  %v1644_v47 = vld [vmem:[#allocation9 + $0x188] sm:$0xff] }
 0x2db   :  { %1726 = vmatpush.msra.mxu3 %v1614_v57  ;;  %1746 = vmatpush.msrb.mxu0 %v1633_v25  ;;  %v1662_v57 = vld [vmem:[#allocation9 + $0x218] sm:$0xff] }
 0x2dc   :  { %1705 = vmatpush.msra.mxu1 %v1596_v11  ;;  %1768 = vmatpush.msrb.mxu2 %v1650_v60  ;;  %v1668_v11 = vld [vmem:[#allocation9 + $0x248] sm:$0xff] }
 0x2dd   :  { %1727 = vmatpush.msra.mxu3 %v1613_v58  ;;  %1747 = vmatpush.msrb.mxu0 %v1632_v9  ;;  %v1661_v58 = vld [vmem:[#allocation9 + $0x210] sm:$0xff] }
 0x2de   :  { %1706 = vmatpush.msra.mxu1 %v1595_v49  ;;  %1769 = vmatpush.msrb.mxu2 %v1649_v40  ;;  %v1666_v49 = vld [vmem:[#allocation9 + $0x238] sm:$0xff] }
 0x2df   :  { %1707 = vmatmul.f32.vlgmr.msra.gmra.mxu1 %v1583_v50  ;;  %1728 = vmatpush.msra.mxu3 %v1612_v53  ;;  %v1680_v50 = vld [vmem:[#allocation9 + $0x2a8] sm:$0xf] }
 0x2e0   :  { %1748 = vmatpush.msrb.mxu0 %v1631_v15  ;;  %1783 = vmatpush.msrb.mxu1 %v1674_v28 }
 0x2e1   :  { %1729 = vmatpush.msra.mxu3 %v1611_v59  ;;  %1770 = vmatpush.msrb.mxu2 %v1648_v26  ;;  %v1660_v59 = vld [vmem:[#allocation9 + $0x208] sm:$0xff] }
 0x2e2   :  { %1749 = vmatpush.msrb.mxu0 %v1630_v34  ;;  %1784 = vmatpush.msrb.mxu1 %v1673_v41 }
 0x2e3   :  { %1771 = vmatpush.msrb.mxu2 %v1647_v7  ;;  %1875 = vmatpush.msk.msrb.mxu3 %vm1687_vm12, %v1680_v50 }
 0x2e4   :  { %1750 = vmatpush.msrb.mxu0 %v1629_v38  ;;  %1785 = vmatpush.msrb.mxu1 %v1672_v61 }
 0x2e5   :  { %1772 = vmatpush.msrb.mxu2 %v1646_v18  ;;  %1817 = vmatpush.msrb.mxu3 %v1679_v55 }
 0x2e6   :  { %1751 = vmatpush.msrb.mxu0 %v1628_v19  ;;  %1786 = vmatpush.msrb.mxu1 %v1671_v45 }
 0x2e7   :  { %1710 = vmatmul.f32.gmra.mxu1 %v1589_v52  ;;  %1773 = vmatpush.msrb.mxu2 %v1645_v35  ;;  %v1442_v52 = vpop.f32.mrf.mxu2 }
 0x2e8   :  { %1752 = vmatpush.msrb.mxu0 %v1627_v54  ;;  %1787 = vmatpush.msrb.mxu1 %v1670_v43 }
 0x2e9   :  { %1774 = vmatpush.msrb.mxu2 %v1644_v47  ;;  %1818 = vmatpush.msrb.mxu3 %v1678_v1 }
 0x2ea   :  { %1788 = vmatpush.msrb.mxu1 %v1669_v48 }
 0x2eb   :  { %1775 = vmatpush.msrb.mxu2 %v1643_v39  ;;  %1819 = vmatpush.msrb.mxu3 %v1677_v5 }
 0x2ec   :  { %1789 = vmatpush.msrb.mxu1 %v1668_v11 }
 0x2ed   :  { %1820 = vmatpush.msrb.mxu3 %v1676_v2 }
 0x2ee   :  { %1790 = vmatpush.msrb.mxu1 %v1667_v27 }
 0x2ef   :  { %1821 = vmatpush.msrb.mxu3 %v1675_v0 }
 0x2f0   :  { %1791 = vmatpush.msrb.mxu1 %v1666_v49 }
 0x2f2   :  { %1792 = vmatpush.msrb.mxu1 %v1665_v44 }
 0x2f4   :  { %1793 = vmatpush.msrb.mxu1 %v1664_v4 }
 0x2f6   :  { %1794 = vmatpush.msrb.mxu1 %v1663_v56 }
 0x2f8   :  { %1795 = vmatpush.msrb.mxu1 %v1662_v57 }
 0x2fa   :  { %1796 = vmatpush.msrb.mxu1 %v1661_v58 }
 0x2fc   :  { %1797 = vmatpush.msrb.mxu1 %v1660_v59 }
 0x2fe   :  { %1798 = vmatpush.msrb.mxu1 %v1659_v6 }
 0x304   :  { %v1370_v32 = vpop.f32.mrf.mxu3 }
 0x305   :  { %v1371_v62 = vadd.f32 %v1370_v32, %v2897_v46 }
 0x307   :  { %v1394_v21 = vadd.f32 %v1393_v13, %v1371_v62 }
 0x309   :  { %v1584_v24 = vmax.f32 %v1394_v21, 0.0 }
 0x30b   :  { %1730 = vmatmul.f32.vlgmr.msra.gmra.mxu3 %v1584_v24 }
 0x30c   :  { %v1373_v31 = vpop.f32.mrf.mxu3 }
 0x30d   :  { %v1374_v42 = vadd.f32 %v1373_v31, %v2900_v22 }
 0x30f   :  { %v1397_v29 = vadd.f32 %v1396_v3, %v1374_v42 }
 0x311   :  { %v1590_v37 = vmax.f32 %v1397_v29, 0.0 }
 0x313   :  { %1733 = vmatmul.f32.gmra.mxu3 %v1590_v37 }
 0x320   :  { %v1485_v8 = vpop.f32.mrf.mxu2 }
 0x326   :  { %v1416_v53 = vpop.f32.mrf.mxu1 }
 0x327   :  { %v1417_v63 = vadd.f32 %v1416_v53, %v2897_v46 }
 0x328   :  { %v1488_v13 = vpop.f32.mrf.mxu2 }
 0x329   :  { %v1440_v12 = vadd.f32 %v1439_v33, %v1417_v63 }
 0x32b   :  { %v1585_v16 = vmax.f32 %v1440_v12, 0.0 }
 0x32d   :  { %1753 = vmatmul.f32.vlgmr.msrb.gmra.mxu0 %v1585_v16 }
 0x32e   :  { %v1419_v51 = vpop.f32.mrf.mxu1  ;;  %v1462_v10 = vpop.f32.mrf.mxu0 }
 0x32f   :  { %v1420_v30 = vadd.f32 %v1419_v51, %v2900_v22  ;;  %v1463_v36 = vadd.f32 %v1462_v10, %v2897_v46 }
 0x331   :  { %v1486_v23 = vadd.f32 %v1485_v8, %v1463_v36  ;;  %v1443_v14 = vadd.f32 %v1442_v52, %v1420_v30 }
 0x333   :  { %v1586_v20 = vmax.f32 %v1486_v23, 0.0  ;;  %v1591_v17 = vmax.f32 %v1443_v14, 0.0 }
 0x335   :  { %1756 = vmatmul.f32.gmra.mxu0 %v1591_v17  ;;  %1776 = vmatmul.f32.vlgmr.msrb.gmra.mxu2 %v1586_v20 }
 0x336   :  { %v1465_v25 = vpop.f32.mrf.mxu0 }
 0x337   :  { %v1466_v9 = vadd.f32 %v1465_v25, %v2900_v22 }
 0x339   :  { %v1489_v32 = vadd.f32 %v1488_v13, %v1466_v9 }
 0x33b   :  { %v1592_v15 = vmax.f32 %v1489_v32, 0.0 }
 0x33c   :  { %v1531_v62 = vpop.f32.mrf.mxu1 }
 0x33d   :  { %1779 = vmatmul.f32.gmra.mxu2 %v1592_v15 }
 0x340   :  { %v1508_v21 = vpop.f32.mrf.mxu3 }
 0x341   :  { %v1509_v34 = vadd.f32 %v1508_v21, %v2897_v46 }
 0x343   :  { %v1532_v60 = vadd.f32 %v1531_v62, %v1509_v34  ;;  %v1577_v24 = vpop.f32.mrf.mxu0 }
 0x344   :  { %v1534_v26 = vpop.f32.mrf.mxu1 }
 0x345   :  { %v1587_v38 = vmax.f32 %v1532_v60, 0.0 }
 0x347   :  { %v1554_v40 = vpop.f32.mrf.mxu2  ;;  %1799 = vmatmul.f32.vlgmr.msrb.gmra.mxu1 %v1587_v38 }
 0x348   :  { %v1555_v28 = vadd.f32 %v1554_v40, %v2897_v46  ;;  %v1511_v19 = vpop.f32.mrf.mxu3 }
 0x349   :  { %v1512_v41 = vadd.f32 %v1511_v19, %v2900_v22 }
 0x34a   :  { %v1578_v31 = vadd.f32 %v1577_v24, %v1555_v28 }
 0x34b   :  { %v1535_v3 = vadd.f32 %v1534_v26, %v1512_v41  ;;  %v1580_v61 = vpop.f32.mrf.mxu0 }
 0x34c   :  { %v1588_v54 = vmax.f32 %v1578_v31, 0.0 }
 0x34d   :  { %v1593_v42 = vmax.f32 %v1535_v3, 0.0 }
 0x34e   :  { %1876 = vmatmul.msk.f32.vlgmr.msrb.gmra.mxu3 %vm692_vm10, %v1588_v54 }
 0x34f   :  { %v1557_v7 = vpop.f32.mrf.mxu2  ;;  %1802 = vmatmul.f32.gmra.mxu1 %v1593_v42 }
 0x350   :  { %v1558_v29 = vadd.f32 %v1557_v7, %v2900_v22 }
 0x352   :  { %v1581_v18 = vadd.f32 %v1580_v61, %v1558_v29 }
 0x354   :  { %v1594_v45 = vmax.f32 %v1581_v18, 0.0 }
 0x356   :  { %1877 = vmatmul.msk.f32.gmra.mxu3 %vm692_vm10, %v1594_v45 }
 0x35c   :  { %v1708_v46 = vpop.f32.mrf.mxu1 }
 0x364   :  { %v1711_v35 = vpop.f32.mrf.mxu1 }
 0x38e   :  { %v1731_v37 = vpop.f32.mrf.mxu3 }
 0x38f   :  { %v1732_v39 = vadd.f32 %v1731_v37, %v1708_v46 }
 0x396   :  { %v1734_v47 = vpop.f32.mrf.mxu3 }
 0x397   :  { %v1735_v4 = vadd.f32 %v1734_v47, %v1711_v35 }
 0x3aa   :  { %v1754_v43 = vpop.f32.mrf.mxu0 }
 0x3ab   :  { %v1755_v27 = vadd.f32 %v1754_v43, %v1732_v39 }
 0x3b2   :  { %v1757_v44 = vpop.f32.mrf.mxu0 }
 0x3b3   :  { %v1758_v56 = vadd.f32 %v1757_v44, %v1735_v4 }
 0x3b8   :  { %v1777_v48 = vpop.f32.mrf.mxu2 }
 0x3b9   :  { %v1778_v33 = vadd.f32 %v1777_v48, %v1755_v27 }
 0x3c0   :  { %v1780_v22 = vpop.f32.mrf.mxu2 }
 0x3c1   :  { %v1781_v57 = vadd.f32 %v1780_v22, %v1758_v56 }
 0x3c4   :  { %v1800_v11 = vpop.f32.mrf.mxu1 }
 0x3c5   :  { %v1801_v49 = vadd.f32 %v1800_v11, %v1778_v33 }
 0x3cc   :  { %v1803_v52 = vpop.f32.mrf.mxu1 }
 0x3cd   :  { %v1804_v58 = vadd.f32 %v1803_v52, %v1781_v57 }
 0x3d1   :  { %v1823_v50 = vpop.f32.mrf.mxu3 }
 0x3d2   :  { %v1824_v55 = vadd.f32 %v1823_v50, %v1801_v49 }
 0x3d4   :  { %1829 = vst [vmem:[#allocation10] sm:$0xff] %v1824_v55 }
 0x3d9   :  { %v1826_v53 = vpop.f32.mrf.mxu3 }
 0x3da   :  { %v1827_v59 = vadd.f32 %v1826_v53, %v1804_v58 }
 0x3dc   :  { %1830 = vst [vmem:[#allocation10 + $0x8] sm:$0xff] %v1827_v59 }
 0x3dd   :  { %1843 = dma.vmem_to_hbm [thread:$0]  %s1836_s16, 256, %s1838_s17, [#allocation6], %s1998_s9, %s1998_s9, %s1999_s10  }
 0x3de   :  { %1995 = dma.done.wait [#allocation6], 256  }
 0x3df   :  { %1996 = vsyncadd [#allocation6], 4294967040 }
 0x3e0   :  { %1848 = vsyncpa [#allocation5], 1 }
 0x3e1   :  { %1849 = vsyncpa [#allocation8], 1 }
 0x3e2   :  { %1850 = vsyncpa [#allocation6], 1 }

</bundles_post_ra>
